<compile_context>
chip_gen: v5e
topology: v5e:2x2
jax: 0.10.0
libtpu: 0.0.40
codegen_flags: <defaults>
</compile_context>

<pallas_src>
import numpy as np

import jax
import jax.numpy as jnp
from jax.experimental import pallas as pl
from jax.experimental.pallas import tpu as pltpu

EPS = 1e-5
VMEM_SPEC = pl.BlockSpec(memory_space=pltpu.MemorySpace.VMEM)


# ----------------------------------------------------------------------------
# Weight-side preprocessing: Conv2d -> dense matmul operator (exact, gather-only)
# ----------------------------------------------------------------------------
def _conv_kidx(H, W, kh, kw, stride, pad):
    """kidx[p, q] = kernel-offset index feeding output q from input position p
    (kh*kw means 'no contribution', i.e. zero)."""
    Ho = (H + 2 * pad - kh) // stride + 1
    Wo = (W + 2 * pad - kw) // stride + 1
    kidx = np.full((H * W, Ho * Wo), kh * kw, dtype=np.int32)
    for ho in range(Ho):
        for wo in range(Wo):
            q = ho * Wo + wo
            for i in range(kh):
                for j in range(kw):
                    h = stride * ho + i - pad
                    w = stride * wo + j - pad
                    if 0 <= h < H and 0 <= w < W:
                        kidx[h * W + w, q] = i * kw + j
    return kidx, Ho, Wo


def _conv_as_matmul(weight_oihw, H, W, stride, pad):
    """Return Kmat (H*W*Cin, Ho*Wo*Cout) so that, with activations flattened
    channels-last as (B, H*W*Cin), the conv is exactly `act @ Kmat`."""
    cout, cin, kh, kw = weight_oihw.shape
    kidx, Ho, Wo = _conv_kidx(H, W, kh, kw, stride, pad)
    # (kh*kw + 1, cin, cout); last slot is the zero entry for "no contribution".
    wmat = jnp.transpose(weight_oihw, (2, 3, 1, 0)).reshape(kh * kw, cin, cout)
    wmat = jnp.concatenate([wmat, jnp.zeros((1, cin, cout), wmat.dtype)], axis=0)
    kmat = wmat[kidx]                                     # (HW, Q, cin, cout) pure gather
    kmat = jnp.transpose(kmat, (0, 2, 1, 3)).reshape(H * W * cin, Ho * Wo * cout)
    return kmat, Ho, Wo


def _channel_mean_op(q, cout, batch):
    """P (q*cout, q*cout): `row_sums @ P` = per-channel mean broadcast back to the
    flat (q, c) layout.  Entries are 0 or 1/(batch*q) (exact powers of 2 here)."""
    r = np.tile(np.eye(cout, dtype=np.float32), (q, 1))   # (q*cout, cout)
    return (r @ r.T) / np.float32(batch * q)              # (q*cout, q*cout)


def _prepare_operands(x_nchw, params, compute_dtype):
    """Flatten x channels-last and build per-layer matmul operands + packed params."""
    B, C, H, W = x_nchw.shape
    if C == 1:
        x_flat = x_nchw.reshape(B, H * W)                 # NCHW == NHWC when C == 1
    else:
        x_flat = jnp.transpose(x_nchw, (0, 2, 3, 1)).reshape(B, H * W * C)
    x_flat = x_flat.astype(compute_dtype)

    kmats, pmats, qcs, gb_rows = [], [], [], []
    h_sp, w_sp = H, W
    for (w, g, b) in params["blocks"]:
        cout = w.shape[0]
        kmat, Ho, Wo = _conv_as_matmul(w, h_sp, w_sp, stride=2, pad=1)
        q = Ho * Wo
        kmats.append(kmat.astype(compute_dtype))
        pmats.append(jnp.asarray(_channel_mean_op(q, cout, B)))
        qcs.append(q * cout)
        # gamma/beta pre-tiled (static, wrapper-side) to the flat (q, c) layout.
        gb_rows.append((jnp.tile(g.astype(jnp.float32), q),
                        jnp.tile(b.astype(jnp.float32), q)))
        h_sp, w_sp = Ho, Wo

    kfin, Ho, Wo = _conv_as_matmul(params["final_w"], h_sp, w_sp, stride=1, pad=0)
    assert (Ho, Wo) == (1, 1)

    # Pack ALL tiny per-channel parameters into ONE (8, padded_w) f32 slab:
    #   row 2*l   = gamma of block l (pre-tiled), row 2*l+1 = beta of block l,
    #   row 2*n_blocks = final-conv bias at lane 0.  One DMA instead of seven.
    padded_w = ((max(qcs + [1]) + 127) // 128) * 128
    rows = []
    for (gr, br), qc in zip(gb_rows, qcs):
        rows.append(jnp.pad(gr, (0, padded_w - qc)))
        rows.append(jnp.pad(br, (0, padded_w - qc)))
    rows.append(jnp.pad(params["final_b"].astype(jnp.float32), (0, padded_w - 1)))
    while len(rows) < 8:
        rows.append(jnp.zeros((padded_w,), jnp.float32))
    prm = jnp.stack(rows, axis=0)                         # (8, padded_w) f32

    operands = []
    for km, pm in zip(kmats, pmats):
        operands += [km, pm]
    operands += [kfin.astype(compute_dtype), prm]
    return x_flat, operands, qcs


# ----------------------------------------------------------------------------
# The single fused Pallas kernel (whole network)
# ----------------------------------------------------------------------------
def _make_fused_kernel(qcs):
    n_blocks = len(qcs)

    def kernel(*refs):
        # refs: x, [kmat, P] * n_blocks, kfin, packed_params, out
        x_ref = refs[0]
        kfin_ref = refs[1 + 2 * n_blocks]
        prm_ref = refs[2 + 2 * n_blocks]
        out_ref = refs[3 + 2 * n_blocks]

        prm = prm_ref[...]                                 # (8, padded_w) f32
        act = x_ref[...]                                   # (B, H*W*C), compute dtype
        for li, qc in enumerate(qcs):
            k_ref = refs[1 + 2 * li]
            p_ref = refs[2 + 2 * li]

            # Conv2d(k=4, s=2, p=1) as one MXU matmul (bf16 in, f32 accumulate).
            z = jnp.dot(act, k_ref[...], preferred_element_type=jnp.float32)  # (B, qc)

            # BatchNorm2d (training-mode batch statistics):
            #   one sublane reduction pass + ONE f32 matmul with the channel
            #   averaging operator P, which reduces per-channel AND broadcasts
            #   the result back to the flat (q, c) layout in the same op.
            col_sum = jnp.sum(z, axis=0, keepdims=True)                       # (1, qc)
            col_sq = jnp.sum(z * z, axis=0, keepdims=True)                    # (1, qc)
            row_ix = jax.lax.broadcasted_iota(jnp.int32, (2, qc), 0)
            stacked = jnp.where(row_ix == 0, col_sum, col_sq)                 # (2, qc), VPU only
            stats = jnp.dot(stacked, p_ref[...],
                            preferred_element_type=jnp.float32)               # (2, qc)
            mean_f = stats[0:1, :]
            var_f = jnp.maximum(stats[1:2, :] - mean_f * mean_f, 0.0)         # biased var

            gamma_f = prm[2 * li:2 * li + 1, :qc]                             # pre-tiled
            beta_f = prm[2 * li + 1:2 * li + 2, :qc]
            scale_f = gamma_f * jax.lax.rsqrt(var_f + EPS)                    # EUP rsqrt
            shift_f = beta_f - mean_f * scale_f

            v = z * scale_f + shift_f
            act = jnp.maximum(v, 0.2 * v).astype(act.dtype)                   # LeakyReLU(0.2)

        # Final Conv2d(k=last_side, s=1, p=0, bias=True) + Sigmoid.
        z = jnp.dot(act, kfin_ref[...], preferred_element_type=jnp.float32)   # (B, 1)
        bias = prm[2 * n_blocks:2 * n_blocks + 1, 0:1]
        out_ref[...] = jax.nn.sigmoid(z + bias)

    return kernel


def seq_forward(x_nchw, params, compute_dtype=jnp.bfloat16):
    """Forward pass of the whole Sequential as one pallas_call.  Returns NCHW (B,1,1,1)."""
    B = x_nchw.shape[0]
    x_flat, operands, qcs = _prepare_operands(x_nchw, params, compute_dtype)
    kernel = _make_fused_kernel(qcs)
    out = pl.pallas_call(
        kernel,
        out_shape=jax.ShapeDtypeStruct((B, 1), jnp.float32),
        in_specs=[VMEM_SPEC] * (1 + len(operands)),
        out_specs=VMEM_SPEC,
        compiler_params=pltpu.CompilerParams(vmem_limit_bytes=32 * 1024 * 1024),
    )(x_flat, *operands)
    return out.reshape(B, 1, 1, 1)


# ----------------------------------------------------------------------------
# Parameter construction (deterministic, mirrors determine_layers + weights_init)
# ----------------------------------------------------------------------------
def build_params(side, num_channels, key):
    assert 4 <= side <= 32
    layer_dims = [(1, side), (num_channels, side // 2)]
    while layer_dims[-1][1] > 3 and len(layer_dims) < 4:
        layer_dims.append((layer_dims[-1][0] * 2, layer_dims[-1][1] // 2))

    params = {"blocks": []}
    for prev, curr in zip(layer_dims, layer_dims[1:]):
        key, kw_, kg_ = jax.random.split(key, 3)
        w = 0.02 * jax.random.normal(kw_, (curr[0], prev[0], 4, 4), jnp.float32)
        g = 1.0 + 0.02 * jax.random.normal(kg_, (curr[0],), jnp.float32)
        b = jnp.zeros((curr[0],), jnp.float32)
        params["blocks"].append((w, g, b))
    key, kw_, kb_ = jax.random.split(key, 3)
    last_c, last_s = layer_dims[-1]
    params["final_w"] = 0.02 * jax.random.normal(kw_, (1, last_c, last_s, last_s),
                                                 jnp.float32)
    params["final_b"] = 0.02 * jax.random.normal(kb_, (1,), jnp.float32)
    return params


# ----------------------------------------------------------------------------
# Pure-JAX reference (numerical verification of the Pallas path)
# ----------------------------------------------------------------------------
def reference_forward(x, params, compute_dtype=jnp.float32):
    hi = jax.lax.Precision.HIGHEST
    h = x
    for (w, g, b) in params["blocks"]:
        z = jax.lax.conv_general_dilated(
            h.astype(compute_dtype), w.astype(compute_dtype), (2, 2), [(1, 1), (1, 1)],
            dimension_numbers=("NCHW", "OIHW", "NCHW"),
            preferred_element_type=jnp.float32, precision=hi)
        mean = jnp.mean(z, axis=(0, 2, 3), keepdims=True)
        var = jnp.mean((z - mean) ** 2, axis=(0, 2, 3), keepdims=True)
        zn = (z - mean) * jax.lax.rsqrt(var + EPS)
        zn = zn * g[None, :, None, None] + b[None, :, None, None]
        h = jnp.where(zn > 0, zn, 0.2 * zn)
    z = jax.lax.conv_general_dilated(
        h.astype(compute_dtype), params["final_w"].astype(compute_dtype), (1, 1),
        [(0, 0), (0, 0)], dimension_numbers=("NCHW", "OIHW", "NCHW"),
        preferred_element_type=jnp.float32, precision=hi)
    z = z + params["final_b"][None, :, None, None]
    return jax.nn.sigmoid(z)


if __name__ == "__main__":
    key = jax.random.PRNGKey(0)
    k_in, k_par = jax.random.split(key)

    side = 16          # input is a (1, side, side) "image" per TableGAN convention
    num_channels = 4   # small
    batch = 2

    x = jax.random.normal(k_in, (batch, 1, side, side), jnp.float32)
    params = build_params(side, num_channels, k_par)

    fwd = jax.jit(seq_forward, static_argnames=("compute_dtype",))

    # Production path: bf16 MXU operands, f32 statistics / activations.
    out = jax.block_until_ready(fwd(x, params, compute_dtype=jnp.bfloat16))
    assert out.shape == (batch, 1, 1, 1), out.shape

    # Strict check of the fused kernel in f32 against the plain-JAX reference.
    out_f32 = jax.block_until_ready(fwd(x, params, compute_dtype=jnp.float32))
    ref_f32 = reference_forward(x, params, jnp.float32)
    assert jnp.allclose(out_f32, ref_f32, atol=3e-4, rtol=3e-4), (out_f32, ref_f32)

    # Looser check of the bf16-MXU path against a matching bf16 reference.
    ref_bf16 = reference_forward(x, params, jnp.bfloat16)
    assert jnp.allclose(out, ref_bf16, atol=2e-2, rtol=2e-2), (out, ref_bf16)

    print("KERNEL_OK")
</pallas_src>

<mosaic_0001>
module attributes {stable_mosaic.version = 11 : i64} {
  func.func @kernel(%arg0: memref<2x256xbf16, #tpu.memory_space<vmem>>, %arg1: memref<256x256xbf16, #tpu.memory_space<vmem>>, %arg2: memref<256x256xf32, #tpu.memory_space<vmem>>, %arg3: memref<256x128xbf16, #tpu.memory_space<vmem>>, %arg4: memref<128x128xf32, #tpu.memory_space<vmem>>, %arg5: memref<128x64xbf16, #tpu.memory_space<vmem>>, %arg6: memref<64x64xf32, #tpu.memory_space<vmem>>, %arg7: memref<64x1xbf16, #tpu.memory_space<vmem>>, %arg8: memref<8x256xf32, #tpu.memory_space<vmem>>, %arg9: memref<2x1xf32, #tpu.memory_space<vmem>>) attributes {dimension_semantics = [], scalar_prefetch = 0 : i64, scratch_operands = 0 : i64, tpu.core_type = #tpu.core_type<tc>} {
    %c0 = arith.constant 0 : index
    %c0_0 = arith.constant 0 : index
    %0 = vector.load %arg8[%c0, %c0_0] : memref<8x256xf32, #tpu.memory_space<vmem>>, vector<8x256xf32>
    %c0_1 = arith.constant 0 : index
    %c0_2 = arith.constant 0 : index
    %1 = vector.load %arg0[%c0_1, %c0_2] : memref<2x256xbf16, #tpu.memory_space<vmem>>, vector<2x256xbf16>
    %c0_3 = arith.constant 0 : index
    %c0_4 = arith.constant 0 : index
    %2 = vector.load %arg1[%c0_3, %c0_4] : memref<256x256xbf16, #tpu.memory_space<vmem>>, vector<256x256xbf16>
    %cst = arith.constant dense<0.000000e+00> : vector<2x256xf32>
    %3 = tpu.matmul %1, %2, %cst {dimension_numbers = #tpu.dot_dimension_numbers<[1], [0], [0], [1], [0, 0, 1, 1], [], []>} : vector<2x256xbf16>, vector<256x256xbf16>, vector<2x256xf32> -> vector<2x256xf32>
    %cst_5 = arith.constant dense<0.000000e+00> : vector<256xf32>
    %4 = vector.multi_reduction <add>, %3, %cst_5 [0] : vector<2x256xf32> to vector<256xf32>
    %5 = vector.shape_cast %4 : vector<256xf32> to vector<1x256xf32>
    %6 = arith.mulf %3, %3 : vector<2x256xf32>
    %cst_6 = arith.constant dense<0.000000e+00> : vector<256xf32>
    %7 = vector.multi_reduction <add>, %6, %cst_6 [0] : vector<2x256xf32> to vector<256xf32>
    %8 = vector.shape_cast %7 : vector<256xf32> to vector<1x256xf32>
    %9 = tpu.iota {dimensions = array<i32: 0>} : vector<2x256xi32>
    %c0_i32 = arith.constant 0 : i32
    %10 = vector.broadcast %c0_i32 : i32 to vector<2x256xi32>
    %11 = arith.cmpi eq, %9, %10 : vector<2x256xi32>
    %12 = vector.shape_cast %5 : vector<1x256xf32> to vector<1x256xf32>
    %13 = vector.broadcast %12 : vector<1x256xf32> to vector<2x256xf32>
    %14 = vector.shape_cast %8 : vector<1x256xf32> to vector<1x256xf32>
    %15 = vector.broadcast %14 : vector<1x256xf32> to vector<2x256xf32>
    %16 = arith.select %11, %13, %15 : vector<2x256xi1>, vector<2x256xf32>
    %c0_7 = arith.constant 0 : index
    %c0_8 = arith.constant 0 : index
    %17 = vector.load %arg2[%c0_7, %c0_8] : memref<256x256xf32, #tpu.memory_space<vmem>>, vector<256x256xf32>
    %cst_9 = arith.constant dense<0.000000e+00> : vector<2x256xf32>
    %18 = tpu.matmul %16, %17, %cst_9 {dimension_numbers = #tpu.dot_dimension_numbers<[1], [0], [0], [1], [0, 0, 1, 1], [], []>} : vector<2x256xf32>, vector<256x256xf32>, vector<2x256xf32> -> vector<2x256xf32>
    %19 = vector.extract_strided_slice %18 {offsets = [0, 0], sizes = [1, 256], strides = [1, 1]} : vector<2x256xf32> to vector<1x256xf32>
    %20 = vector.extract_strided_slice %18 {offsets = [1, 0], sizes = [1, 256], strides = [1, 1]} : vector<2x256xf32> to vector<1x256xf32>
    %21 = arith.mulf %19, %19 : vector<1x256xf32>
    %22 = arith.subf %20, %21 : vector<1x256xf32>
    %cst_10 = arith.constant 0.000000e+00 : f32
    %23 = vector.broadcast %cst_10 : f32 to vector<1x256xf32>
    %24 = arith.maximumf %22, %23 : vector<1x256xf32>
    %25 = vector.extract_strided_slice %0 {offsets = [0, 0], sizes = [1, 256], strides = [1, 1]} : vector<8x256xf32> to vector<1x256xf32>
    %26 = vector.extract_strided_slice %0 {offsets = [1, 0], sizes = [1, 256], strides = [1, 1]} : vector<8x256xf32> to vector<1x256xf32>
    %cst_11 = arith.constant 9.99999974E-6 : f32
    %27 = vector.broadcast %cst_11 : f32 to vector<1x256xf32>
    %28 = arith.addf %24, %27 : vector<1x256xf32>
    %29 = math.rsqrt %28 : vector<1x256xf32>
    %30 = arith.mulf %25, %29 : vector<1x256xf32>
    %31 = arith.mulf %19, %30 : vector<1x256xf32>
    %32 = arith.subf %26, %31 : vector<1x256xf32>
    %33 = vector.broadcast %30 : vector<1x256xf32> to vector<2x256xf32>
    %34 = arith.mulf %3, %33 : vector<2x256xf32>
    %35 = vector.broadcast %32 : vector<1x256xf32> to vector<2x256xf32>
    %36 = arith.addf %34, %35 : vector<2x256xf32>
    %cst_12 = arith.constant 2.000000e-01 : f32
    %37 = vector.broadcast %cst_12 : f32 to vector<2x256xf32>
    %38 = arith.mulf %37, %36 : vector<2x256xf32>
    %39 = arith.maximumf %36, %38 : vector<2x256xf32>
    %40 = arith.truncf %39 : vector<2x256xf32> to vector<2x256xbf16>
    %c0_13 = arith.constant 0 : index
    %c0_14 = arith.constant 0 : index
    %41 = vector.load %arg3[%c0_13, %c0_14] : memref<256x128xbf16, #tpu.memory_space<vmem>>, vector<256x128xbf16>
    %cst_15 = arith.constant dense<0.000000e+00> : vector<2x128xf32>
    %42 = tpu.matmul %40, %41, %cst_15 {dimension_numbers = #tpu.dot_dimension_numbers<[1], [0], [0], [1], [0, 0, 1, 1], [], []>} : vector<2x256xbf16>, vector<256x128xbf16>, vector<2x128xf32> -> vector<2x128xf32>
    %cst_16 = arith.constant dense<0.000000e+00> : vector<128xf32>
    %43 = vector.multi_reduction <add>, %42, %cst_16 [0] : vector<2x128xf32> to vector<128xf32>
    %44 = vector.shape_cast %43 : vector<128xf32> to vector<1x128xf32>
    %45 = arith.mulf %42, %42 : vector<2x128xf32>
    %cst_17 = arith.constant dense<0.000000e+00> : vector<128xf32>
    %46 = vector.multi_reduction <add>, %45, %cst_17 [0] : vector<2x128xf32> to vector<128xf32>
    %47 = vector.shape_cast %46 : vector<128xf32> to vector<1x128xf32>
    %48 = tpu.iota {dimensions = array<i32: 0>} : vector<2x128xi32>
    %c0_i32_18 = arith.constant 0 : i32
    %49 = vector.broadcast %c0_i32_18 : i32 to vector<2x128xi32>
    %50 = arith.cmpi eq, %48, %49 : vector<2x128xi32>
    %51 = vector.shape_cast %44 : vector<1x128xf32> to vector<1x128xf32>
    %52 = vector.broadcast %51 : vector<1x128xf32> to vector<2x128xf32>
    %53 = vector.shape_cast %47 : vector<1x128xf32> to vector<1x128xf32>
    %54 = vector.broadcast %53 : vector<1x128xf32> to vector<2x128xf32>
    %55 = arith.select %50, %52, %54 : vector<2x128xi1>, vector<2x128xf32>
    %c0_19 = arith.constant 0 : index
    %c0_20 = arith.constant 0 : index
    %56 = vector.load %arg4[%c0_19, %c0_20] : memref<128x128xf32, #tpu.memory_space<vmem>>, vector<128x128xf32>
    %cst_21 = arith.constant dense<0.000000e+00> : vector<2x128xf32>
    %57 = tpu.matmul %55, %56, %cst_21 {dimension_numbers = #tpu.dot_dimension_numbers<[1], [0], [0], [1], [0, 0, 1, 1], [], []>} : vector<2x128xf32>, vector<128x128xf32>, vector<2x128xf32> -> vector<2x128xf32>
    %58 = vector.extract_strided_slice %57 {offsets = [0, 0], sizes = [1, 128], strides = [1, 1]} : vector<2x128xf32> to vector<1x128xf32>
    %59 = vector.extract_strided_slice %57 {offsets = [1, 0], sizes = [1, 128], strides = [1, 1]} : vector<2x128xf32> to vector<1x128xf32>
    %60 = arith.mulf %58, %58 : vector<1x128xf32>
    %61 = arith.subf %59, %60 : vector<1x128xf32>
    %cst_22 = arith.constant 0.000000e+00 : f32
    %62 = vector.broadcast %cst_22 : f32 to vector<1x128xf32>
    %63 = arith.maximumf %61, %62 : vector<1x128xf32>
    %64 = vector.extract_strided_slice %0 {offsets = [2, 0], sizes = [1, 128], strides = [1, 1]} : vector<8x256xf32> to vector<1x128xf32>
    %65 = vector.extract_strided_slice %0 {offsets = [3, 0], sizes = [1, 128], strides = [1, 1]} : vector<8x256xf32> to vector<1x128xf32>
    %cst_23 = arith.constant 9.99999974E-6 : f32
    %66 = vector.broadcast %cst_23 : f32 to vector<1x128xf32>
    %67 = arith.addf %63, %66 : vector<1x128xf32>
    %68 = math.rsqrt %67 : vector<1x128xf32>
    %69 = arith.mulf %64, %68 : vector<1x128xf32>
    %70 = arith.mulf %58, %69 : vector<1x128xf32>
    %71 = arith.subf %65, %70 : vector<1x128xf32>
    %72 = vector.broadcast %69 : vector<1x128xf32> to vector<2x128xf32>
    %73 = arith.mulf %42, %72 : vector<2x128xf32>
    %74 = vector.broadcast %71 : vector<1x128xf32> to vector<2x128xf32>
    %75 = arith.addf %73, %74 : vector<2x128xf32>
    %cst_24 = arith.constant 2.000000e-01 : f32
    %76 = vector.broadcast %cst_24 : f32 to vector<2x128xf32>
    %77 = arith.mulf %76, %75 : vector<2x128xf32>
    %78 = arith.maximumf %75, %77 : vector<2x128xf32>
    %79 = arith.truncf %78 : vector<2x128xf32> to vector<2x128xbf16>
    %c0_25 = arith.constant 0 : index
    %c0_26 = arith.constant 0 : index
    %80 = vector.load %arg5[%c0_25, %c0_26] : memref<128x64xbf16, #tpu.memory_space<vmem>>, vector<128x64xbf16>
    %cst_27 = arith.constant dense<0.000000e+00> : vector<2x64xf32>
    %81 = tpu.matmul %79, %80, %cst_27 {dimension_numbers = #tpu.dot_dimension_numbers<[1], [0], [0], [1], [0, 0, 1, 1], [], []>} : vector<2x128xbf16>, vector<128x64xbf16>, vector<2x64xf32> -> vector<2x64xf32>
    %cst_28 = arith.constant dense<0.000000e+00> : vector<64xf32>
    %82 = vector.multi_reduction <add>, %81, %cst_28 [0] : vector<2x64xf32> to vector<64xf32>
    %83 = vector.shape_cast %82 : vector<64xf32> to vector<1x64xf32>
    %84 = arith.mulf %81, %81 : vector<2x64xf32>
    %cst_29 = arith.constant dense<0.000000e+00> : vector<64xf32>
    %85 = vector.multi_reduction <add>, %84, %cst_29 [0] : vector<2x64xf32> to vector<64xf32>
    %86 = vector.shape_cast %85 : vector<64xf32> to vector<1x64xf32>
    %87 = tpu.iota {dimensions = array<i32: 0>} : vector<2x64xi32>
    %c0_i32_30 = arith.constant 0 : i32
    %88 = vector.broadcast %c0_i32_30 : i32 to vector<2x64xi32>
    %89 = arith.cmpi eq, %87, %88 : vector<2x64xi32>
    %90 = vector.shape_cast %83 : vector<1x64xf32> to vector<1x64xf32>
    %91 = vector.broadcast %90 : vector<1x64xf32> to vector<2x64xf32>
    %92 = vector.shape_cast %86 : vector<1x64xf32> to vector<1x64xf32>
    %93 = vector.broadcast %92 : vector<1x64xf32> to vector<2x64xf32>
    %94 = arith.select %89, %91, %93 : vector<2x64xi1>, vector<2x64xf32>
    %c0_31 = arith.constant 0 : index
    %c0_32 = arith.constant 0 : index
    %95 = vector.load %arg6[%c0_31, %c0_32] : memref<64x64xf32, #tpu.memory_space<vmem>>, vector<64x64xf32>
    %cst_33 = arith.constant dense<0.000000e+00> : vector<2x64xf32>
    %96 = tpu.matmul %94, %95, %cst_33 {dimension_numbers = #tpu.dot_dimension_numbers<[1], [0], [0], [1], [0, 0, 1, 1], [], []>} : vector<2x64xf32>, vector<64x64xf32>, vector<2x64xf32> -> vector<2x64xf32>
    %97 = vector.extract_strided_slice %96 {offsets = [0, 0], sizes = [1, 64], strides = [1, 1]} : vector<2x64xf32> to vector<1x64xf32>
    %98 = vector.extract_strided_slice %96 {offsets = [1, 0], sizes = [1, 64], strides = [1, 1]} : vector<2x64xf32> to vector<1x64xf32>
    %99 = arith.mulf %97, %97 : vector<1x64xf32>
    %100 = arith.subf %98, %99 : vector<1x64xf32>
    %cst_34 = arith.constant 0.000000e+00 : f32
    %101 = vector.broadcast %cst_34 : f32 to vector<1x64xf32>
    %102 = arith.maximumf %100, %101 : vector<1x64xf32>
    %103 = vector.extract_strided_slice %0 {offsets = [4, 0], sizes = [1, 64], strides = [1, 1]} : vector<8x256xf32> to vector<1x64xf32>
    %104 = vector.extract_strided_slice %0 {offsets = [5, 0], sizes = [1, 64], strides = [1, 1]} : vector<8x256xf32> to vector<1x64xf32>
    %cst_35 = arith.constant 9.99999974E-6 : f32
    %105 = vector.broadcast %cst_35 : f32 to vector<1x64xf32>
    %106 = arith.addf %102, %105 : vector<1x64xf32>
    %107 = math.rsqrt %106 : vector<1x64xf32>
    %108 = arith.mulf %103, %107 : vector<1x64xf32>
    %109 = arith.mulf %97, %108 : vector<1x64xf32>
    %110 = arith.subf %104, %109 : vector<1x64xf32>
    %111 = vector.broadcast %108 : vector<1x64xf32> to vector<2x64xf32>
    %112 = arith.mulf %81, %111 : vector<2x64xf32>
    %113 = vector.broadcast %110 : vector<1x64xf32> to vector<2x64xf32>
    %114 = arith.addf %112, %113 : vector<2x64xf32>
    %cst_36 = arith.constant 2.000000e-01 : f32
    %115 = vector.broadcast %cst_36 : f32 to vector<2x64xf32>
    %116 = arith.mulf %115, %114 : vector<2x64xf32>
    %117 = arith.maximumf %114, %116 : vector<2x64xf32>
    %118 = arith.truncf %117 : vector<2x64xf32> to vector<2x64xbf16>
    %c0_37 = arith.constant 0 : index
    %c0_38 = arith.constant 0 : index
    %119 = vector.load %arg7[%c0_37, %c0_38] : memref<64x1xbf16, #tpu.memory_space<vmem>>, vector<64x1xbf16>
    %cst_39 = arith.constant dense<0.000000e+00> : vector<2x1xf32>
    %120 = tpu.matmul %118, %119, %cst_39 {dimension_numbers = #tpu.dot_dimension_numbers<[1], [0], [0], [1], [0, 0, 1, 1], [], []>} : vector<2x64xbf16>, vector<64x1xbf16>, vector<2x1xf32> -> vector<2x1xf32>
    %121 = vector.extract_strided_slice %0 {offsets = [6, 0], sizes = [1, 1], strides = [1, 1]} : vector<8x256xf32> to vector<1x1xf32>
    %122 = vector.broadcast %121 : vector<1x1xf32> to vector<2x1xf32>
    %123 = arith.addf %120, %122 : vector<2x1xf32>
    %124 = arith.negf %123 : vector<2x1xf32>
    %125 = math.exp %124 : vector<2x1xf32>
    %cst_40 = arith.constant 1.000000e+00 : f32
    %126 = vector.broadcast %cst_40 : f32 to vector<2x1xf32>
    %127 = arith.addf %126, %125 : vector<2x1xf32>
    %128 = arith.divf %126, %127 : vector<2x1xf32>
    %c0_41 = arith.constant 0 : index
    %c0_42 = arith.constant 0 : index
    %129 = vector.load %arg9[%c0_41, %c0_42] : memref<2x1xf32, #tpu.memory_space<vmem>>, vector<2x1xf32>
    tpu.vector_store %arg9[%c0_41, %c0_42], %128 {strides = array<i32>} : memref<2x1xf32, #tpu.memory_space<vmem>>, vector<2x1xf32>,
    return
  }
}

</mosaic_0001>

<bundles_post_ra>
// kernel: tile.33
= control target key start
LH: loop header
LB: loop body
LE: loop exit
PB: predicated region body
PF: predicated region fallthrough
CT: control target
= control target key end

     0   :  { %s64_s0 = inlined_call_operand.vmem [shape: f32[4], index: 0, kind: input, shape index: {}]   ;;  %s65_s1 = inlined_call_operand.vmem [shape: f32[64,4], index: 1, kind: output, shape index: {}]  }
   0x1   :  { %v4_v0 = vld [vmem:[%s64_s0] ss:$0 sm:$0xff] }
   0x2   :  { %5 = vst [vmem:[%s65_s1] sm:$0xff] %v4_v0 }
   0x3   :  { %20 = vst [vmem:[%s65_s1 + $0x8] sm:$0xff] %v4_v0 }
   0x4   :  { %21 = vst [vmem:[%s65_s1 + $0x10] sm:$0xff] %v4_v0 }
   0x5   :  { %22 = vst [vmem:[%s65_s1 + $0x18] sm:$0xff] %v4_v0 }
   0x6   :  { %23 = vst [vmem:[%s65_s1 + $0x20] sm:$0xff] %v4_v0 }
   0x7   :  { %24 = vst [vmem:[%s65_s1 + $0x28] sm:$0xff] %v4_v0 }
   0x8   :  { %25 = vst [vmem:[%s65_s1 + $0x30] sm:$0xff] %v4_v0 }
   0x9   :  { %26 = vst [vmem:[%s65_s1 + $0x38] sm:$0xff] %v4_v0 }

// kernel: tile.43
= control target key start
LH: loop header
LB: loop body
LE: loop exit
PB: predicated region body
PF: predicated region fallthrough
CT: control target
= control target key end

     0   :  { %s28_s0 = inlined_call_operand.vmem [shape: f32[8], index: 0, kind: input, shape index: {}]   ;;  %s29_s1 = inlined_call_operand.vmem [shape: f32[16,8], index: 1, kind: output, shape index: {}]  }
   0x1   :  { %v4_v0 = vld [vmem:[%s28_s0] ss:$0 sm:$0xff] }
   0x2   :  { %5 = vst [vmem:[%s29_s1] sm:$0xff] %v4_v0 }
   0x3   :  { %8 = vst [vmem:[%s29_s1 + $0x8] sm:$0xff] %v4_v0 }

// kernel: tile.44
= control target key start
LH: loop header
LB: loop body
LE: loop exit
PB: predicated region body
PF: predicated region fallthrough
CT: control target
= control target key end

     0   :  { %s131_s10 = smov 120   ;;  %s132_s11 = smov 104   ;;  %vm3_vm0 = vcmask 64512   ;;  %vm9_vm1 = vcmask 1048512   ;;  %vm15_vm2 = vcmask 982912   ;;  %vm21_vm3 = vcmask 917312   ;;  %s207_s0 = inlined_call_operand.vmem [shape: f32[16,8], index: 0, kind: input, shape index: {}]   ;;  %s208_s1 = inlined_call_operand.vmem [shape: f32[128], index: 1, kind: output, shape index: {}]  }
   0x1   :  { %v101_v0 = vld [vmem:[%s207_s0 + $0xf] sm:$0x1]   ;;  %v103_v1 = vld [vmem:[%s207_s0 + $0xd] sm:$0x1]   ;;  %v105_v2 = vld [vmem:[%s207_s0 + $0xb] sm:$0x1]  }
   0x2   :  { %7 = vrot.lane.b32.xlu0 %v101_v0, %s131_s10  ;;  %19 = vrot.lane.b32.xlu1 %v103_v1, %s132_s11  ;;  %s133_s14 = smov 88   ;;  %v102_v3 = vld [vmem:[%s207_s0 + $0xe] sm:$0x1]   ;;  %v104_v4 = vld [vmem:[%s207_s0 + $0xc] sm:$0x1]   ;;  %s134_s19 = smov 112  }
   0x3   :  { %31 = vrot.lane.b32.xlu2 %v105_v2, %s133_s14  ;;  %s135_s20 = smov 96   ;;  %v106_v5 = vld [vmem:[%s207_s0 + $0xa] sm:$0x1]   ;;  %s136_s23 = smov 80   ;;  %v107_v6 = vld [vmem:[%s207_s0 + $0x9] sm:$0x1]  }
   0x4   :  { %v108_v7 = vld [vmem:[%s207_s0 + $0x8] sm:$0x1]   ;;  %s137_s28 = smov 72   ;;  %s138_s29 = smov 64   ;;  %v109_v8 = vld [vmem:[%s207_s0 + $0x7] sm:$0x1]  }
   0x5   :  { %s139_s3 = smov 56   ;;  %v110_v9 = vld [vmem:[%s207_s0 + $0x6] sm:$0x1]   ;;  %v111_v10 = vld [vmem:[%s207_s0 + $0x5] sm:$0x1]   ;;  %s140_s8 = smov 48  }
   0x6   :  { %s141_s9 = smov 40   ;;  %v112_v11 = vld [vmem:[%s207_s0 + $0x4] sm:$0x1]   ;;  %s142_s12 = smov 32   ;;  %v113_v12 = vld [vmem:[%s207_s0 + $0x3] sm:$0x1]  }
   0x7   :  { %v114_v13 = vld [vmem:[%s207_s0 + $0x2] sm:$0x1]   ;;  %s143_s17 = smov 24   ;;  %s144_s18 = smov 16   ;;  %v115_v14 = vld [vmem:[%s207_s0 + $0x1] sm:$0x1]  }
   0x8   :  { %s145_s21 = smov 8   ;;  %v2_v15 = vld [vmem:[%s207_s0] sm:$0x1]   ;;  %vm27_vm4 = vcmask 851712   ;;  %vm33_vm5 = vcmask 786112   ;;  %vm39_vm6 = vcmask 720512  }
   0x9   :  { %4 = vst.msk [vmem:[#allocation0] sm:$0x1] %vm3_vm0, %v2_v15   ;;  %vm45_vm7 = vcmask 654912   ;;  %vm51_vm8 = vcmask 589312   ;;  %vm57_vm9 = vcmask 523712   ;;  %vm63_vm10 = vcmask 458112  }
   0xa   :  { %13 = vrot.lane.b32.xlu0 %v102_v3, %s134_s19  ;;  %25 = vrot.lane.b32.xlu1 %v104_v4, %s135_s20  ;;  %vm69_vm11 = vcmask 392512   ;;  %vm75_vm12 = vcmask 326912   ;;  %vm81_vm13 = vcmask 261312   ;;  %vm87_vm14 = vcmask 195712  }
   0xb   :  { %37 = vrot.lane.b32.xlu2 %v106_v5, %s136_s23  ;;  %vm93_vm15 = vcmask 130112  }
  0x12   :  { %43 = vrot.lane.b32.xlu0 %v107_v6, %s137_s28  ;;  %49 = vrot.lane.b32.xlu1 %v108_v7, %s138_s29 }
  0x13   :  { %55 = vrot.lane.b32.xlu2 %v109_v8, %s139_s3 }
  0x1a   :  { %61 = vrot.lane.b32.xlu0 %v110_v9, %s140_s8  ;;  %67 = vrot.lane.b32.xlu1 %v111_v10, %s141_s9 }
  0x1b   :  { %73 = vrot.lane.b32.xlu2 %v112_v11, %s142_s12 }
  0x22   :  { %79 = vrot.lane.b32.xlu0 %v113_v12, %s143_s17  ;;  %85 = vrot.lane.b32.xlu1 %v114_v13, %s144_s18 }
  0x23   :  { %91 = vrot.lane.b32.xlu2 %v115_v14, %s145_s21 }
  0x5d   :  { %v32_v16 = vpop.permute.xlu2 %31  }
  0x65   :  { %v38_v17 = vpop.permute.xlu2 %37  }
  0x6d   :  { %v56_v18 = vpop.permute.xlu2 %55  }
  0x74   :  { %v8_v19 = vpop.permute.xlu0 %7   ;;  %v20_v20 = vpop.permute.xlu1 %19  }
  0x75   :  { %10 = vst.msk [vmem:[#allocation0] sm:$0x1] %vm9_vm1, %v8_v19   ;;  %v74_v21 = vpop.permute.xlu2 %73  }
  0x7c   :  { %v14_v22 = vpop.permute.xlu0 %13   ;;  %v26_v23 = vpop.permute.xlu1 %25  }
  0x7d   :  { %16 = vst.msk [vmem:[#allocation0] sm:$0x1] %vm15_vm2, %v14_v22   ;;  %v92_v24 = vpop.permute.xlu2 %91  }
  0x7e   :  { %22 = vst.msk [vmem:[#allocation0] sm:$0x1] %vm21_vm3, %v20_v20  }
  0x7f   :  { %28 = vst.msk [vmem:[#allocation0] sm:$0x1] %vm27_vm4, %v26_v23  }
  0x80   :  { %34 = vst.msk [vmem:[#allocation0] sm:$0x1] %vm33_vm5, %v32_v16  }
  0x81   :  { %40 = vst.msk [vmem:[#allocation0] sm:$0x1] %vm39_vm6, %v38_v17  }
  0x84   :  { %v44_v25 = vpop.permute.xlu0 %43   ;;  %v50_v26 = vpop.permute.xlu1 %49  }
  0x85   :  { %46 = vst.msk [vmem:[#allocation0] sm:$0x1] %vm45_vm7, %v44_v25  }
  0x86   :  { %52 = vst.msk [vmem:[#allocation0] sm:$0x1] %vm51_vm8, %v50_v26  }
  0x87   :  { %58 = vst.msk [vmem:[#allocation0] sm:$0x1] %vm57_vm9, %v56_v18  }
  0x8c   :  { %v62_v27 = vpop.permute.xlu0 %61   ;;  %v68_v28 = vpop.permute.xlu1 %67  }
  0x8d   :  { %64 = vst.msk [vmem:[#allocation0] sm:$0x1] %vm63_vm10, %v62_v27  }
  0x8e   :  { %70 = vst.msk [vmem:[#allocation0] sm:$0x1] %vm69_vm11, %v68_v28  }
  0x8f   :  { %76 = vst.msk [vmem:[#allocation0] sm:$0x1] %vm75_vm12, %v74_v21  }
  0x94   :  { %v80_v29 = vpop.permute.xlu0 %79   ;;  %v86_v30 = vpop.permute.xlu1 %85  }
  0x95   :  { %82 = vst.msk [vmem:[#allocation0] sm:$0x1] %vm81_vm13, %v80_v29  }
  0x96   :  { %88 = vst.msk [vmem:[#allocation0] sm:$0x1] %vm87_vm14, %v86_v30  }
  0x97   :  { %94 = vst.msk [vmem:[#allocation0] sm:$0x1] %vm93_vm15, %v92_v24  }
  0x9e   :  { %v97_v31 = vld [vmem:[#allocation0] sm:$0x1] }
  0x9f   :  { %100 = vst [vmem:[%s208_s1] sm:$0x1] %v97_v31 }

// kernel: tile.53
= control target key start
LH: loop header
LB: loop body
LE: loop exit
PB: predicated region body
PF: predicated region fallthrough
CT: control target
= control target key end

     0   :  { %s22_s0 = inlined_call_operand.vmem [shape: f32[16], index: 0, kind: input, shape index: {}]   ;;  %s23_s1 = inlined_call_operand.vmem [shape: f32[4,16], index: 1, kind: output, shape index: {}]  }
   0x1   :  { %v4_v0 = vld [vmem:[%s22_s0] ss:$0 sm:$0xff] }
   0x2   :  { %5 = vst [vmem:[%s23_s1] sm:$0xf] %v4_v0 }

// kernel: tile.54
= control target key start
LH: loop header
LB: loop body
LE: loop exit
PB: predicated region body
PF: predicated region fallthrough
CT: control target
= control target key end

     0   :  { %s37_s8 = smov 16   ;;  %s38_s9 = smov 32   ;;  %vm7_vm0 = vcmask 130048   ;;  %vm13_vm1 = vcmask 523648   ;;  %vm19_vm2 = vcmask 392448   ;;  %vm25_vm3 = vcmask 261248   ;;  %s55_s0 = inlined_call_operand.vmem [shape: f32[4,16], index: 0, kind: input, shape index: {}]   ;;  %s56_s1 = inlined_call_operand.vmem [shape: f32[64], index: 1, kind: output, shape index: {}]  }
   0x1   :  { %v4_v0 = vld [vmem:[%s55_s0] sm:$0xf]  ;;  %s36_s0 = smov 48  }
   0x2   :  { %5 = vst [vmem:[#allocation1] sm:$0xf] %v4_v0 }
   0x9   :  { %v10_v1 = vld [vmem:[#allocation1 + $0x3] sm:$0x1]   ;;  %v22_v2 = vld [vmem:[#allocation1 + $0x1] sm:$0x1]   ;;  %v16_v3 = vld [vmem:[#allocation1 + $0x2] sm:$0x1]  }
   0xa   :  { %11 = vrot.lane.b32.xlu0 %v10_v1, %s36_s0  ;;  %23 = vrot.lane.b32.xlu1 %v22_v2, %s37_s8  ;;  %v6_v4 = vld [vmem:[#allocation1] sm:$0x1]  }
   0xb   :  { %8 = vst.msk [vmem:[#allocation0] sm:$0x1] %vm7_vm0, %v6_v4  }
  0x12   :  { %17 = vrot.lane.b32.xlu0 %v16_v3, %s38_s9 }
  0x7c   :  { %v12_v5 = vpop.permute.xlu0 %11   ;;  %v24_v6 = vpop.permute.xlu1 %23  }
  0x7d   :  { %14 = vst.msk [vmem:[#allocation0] sm:$0x1] %vm13_vm1, %v12_v5  }
  0x84   :  { %v18_v7 = vpop.permute.xlu0 %17  }
  0x85   :  { %20 = vst.msk [vmem:[#allocation0] sm:$0x1] %vm19_vm2, %v18_v7  }
  0x86   :  { %26 = vst.msk [vmem:[#allocation0] sm:$0x1] %vm25_vm3, %v24_v6  }
  0x8d   :  { %v29_v8 = vld [vmem:[#allocation0] sm:$0x1] }
  0x8e   :  { %32 = vst [vmem:[%s56_s1] sm:$0x1] %v29_v8 }

// kernel: seq_forward.1
= control target key start
LH: loop header
LB: loop body
LE: loop exit
PB: predicated region body
PF: predicated region fallthrough
CT: control target
= control target key end

     0   :  { %vm286_vm0 = vcmask 1041408   ;;  %vm851_vm11 = vcmask 517120   ;;  %vm876_vm12 = vcmask 523264   ;;  %s1979_s1 = inlined_call_operand.vmem [shape: bf16[256,256], index: 1, kind: input, shape index: {}]   ;;  %s1980_s0 = inlined_call_operand.vmem [shape: bf16[2,256], index: 0, kind: input, shape index: {}]   ;;  %s1981_s2 = inlined_call_operand.vmem [shape: f32[256,256], index: 2, kind: input, shape index: {}]   ;;  %s1982_s3 = inlined_call_operand.vmem [shape: bf16[256,128], index: 3, kind: input, shape index: {}]   ;;  %s1983_s4 = inlined_call_operand.vmem [shape: f32[128,128], index: 4, kind: input, shape index: {}]   ;;  %s1984_s8 = inlined_call_operand.vmem [shape: f32[8,256], index: 8, kind: input, shape index: {}]   ;;  %s1985_s5 = inlined_call_operand.vmem [shape: bf16[128,64], index: 5, kind: input, shape index: {}]   ;;  %s1986_s6 = inlined_call_operand.vmem [shape: f32[64,64], index: 6, kind: input, shape index: {}]   ;;  %s1987_s7 = inlined_call_operand.vmem [shape: bf16[64,1], index: 7, kind: input, shape index: {}]   ;;  %s1988_s9 = inlined_call_operand.vmem [shape: f32[2,1], index: 9, kind: output, shape index: {}]  }
   0x1   :  { %v1068_v0 = vld [vmem:[%s1979_s1 + $0x70] sm:$0xf]  ;;  %v1268_v1 = vld [vmem:[%s1979_s1 + $0x74] sm:$0xf0]  ;;  %v1267_v5 = vld [vmem:[%s1979_s1 + $0x74] sm:$0xf] }
   0x2   :  { %v1132_v2 = vld [vmem:[%s1979_s1 + $0xf0] sm:$0xf]  ;;  %v1069_v3 = vor.u32 %v1268_v1, %v1068_v0  ;;  %v1284_v4 = vld [vmem:[%s1979_s1 + $0xf4] sm:$0xf0]  ;;  %v1070_v6 = vld [vmem:[%s1979_s1 + $0x78] sm:$0xf0] }
   0x3   :  { %v1133_v7 = vor.u32 %v1284_v4, %v1132_v2  ;;  %v1073_v8 = vor.u32 %v1267_v5, %v1070_v6  ;;  %v1283_v9 = vld [vmem:[%s1979_s1 + $0xf4] sm:$0xf]  ;;  %v1134_v10 = vld [vmem:[%s1979_s1 + $0xf8] sm:$0xf0]  ;;  %v1060_v11 = vld [vmem:[%s1979_s1 + $0x60] sm:$0xf] }
   0x4   :  { %234 = vmatpush.bf16.msra.mxu0 %v1069_v3  ;;  %v1137_v12 = vor.u32 %v1283_v9, %v1134_v10  ;;  %v1266_v13 = vld [vmem:[%s1979_s1 + $0x64] sm:$0xf0]  ;;  %v1124_v14 = vld [vmem:[%s1979_s1 + $0xe0] sm:$0xf]  ;;  %v1265_v18 = vld [vmem:[%s1979_s1 + $0x64] sm:$0xf] }
   0x5   :  { %v1282_v15 = vld [vmem:[%s1979_s1 + $0xe4] sm:$0xf0]  ;;  %247 = vmatpush.bf16.msra.mxu1 %v1133_v7  ;;  %260 = vmatpush.bf16.msra.mxu2 %v1073_v8  ;;  %v1061_v16 = vor.u32 %v1266_v13, %v1060_v11  ;;  %v1062_v19 = vld [vmem:[%s1979_s1 + $0x68] sm:$0xf0]  ;;  %v1281_v20 = vld [vmem:[%s1979_s1 + $0xe4] sm:$0xf] }
   0x6   :  { %v1125_v17 = vor.u32 %v1282_v15, %v1124_v14  ;;  %273 = vmatpush.bf16.msra.mxu3 %v1137_v12  ;;  %v1065_v21 = vor.u32 %v1265_v18, %v1062_v19  ;;  %v1126_v22 = vld [vmem:[%s1979_s1 + $0xe8] sm:$0xf0]  ;;  %v1052_v23 = vld [vmem:[%s1979_s1 + $0x50] sm:$0xf]  ;;  %v1264_v24 = vld [vmem:[%s1979_s1 + $0x54] sm:$0xf0] }
   0x7   :  { %v1129_v25 = vor.u32 %v1281_v20, %v1126_v22  ;;  %v1116_v26 = vld [vmem:[%s1979_s1 + $0xd0] sm:$0xf]  ;;  %v1280_v27 = vld [vmem:[%s1979_s1 + $0xd4] sm:$0xf0]  ;;  %v1263_v28 = vld [vmem:[%s1979_s1 + $0x54] sm:$0xf]  ;;  %v1053_v29 = vor.u32 %v1264_v24, %v1052_v23 }
   0x8   :  { %235 = vmatpush.bf16.msra.mxu0 %v1061_v16  ;;  %v1054_v30 = vld [vmem:[%s1979_s1 + $0x58] sm:$0xf0]  ;;  %v1279_v31 = vld [vmem:[%s1979_s1 + $0xd4] sm:$0xf]  ;;  %v1117_v33 = vor.u32 %v1280_v27, %v1116_v26  ;;  %v1044_v35 = vld [vmem:[%s1979_s1 + $0x40] sm:$0xf] }
   0x9   :  { %v1118_v32 = vld [vmem:[%s1979_s1 + $0xd8] sm:$0xf0]  ;;  %248 = vmatpush.bf16.msra.mxu1 %v1125_v17  ;;  %261 = vmatpush.bf16.msra.mxu2 %v1065_v21  ;;  %v1057_v34 = vor.u32 %v1263_v28, %v1054_v30  ;;  %v1262_v36 = vld [vmem:[%s1979_s1 + $0x44] sm:$0xf0]  ;;  %v1108_v37 = vld [vmem:[%s1979_s1 + $0xc0] sm:$0xf] }
   0xa   :  { %274 = vmatpush.bf16.msra.mxu3 %v1129_v25  ;;  %v1121_v38 = vor.u32 %v1279_v31, %v1118_v32  ;;  %v1278_v39 = vld [vmem:[%s1979_s1 + $0xc4] sm:$0xf0]  ;;  %v1261_v40 = vld [vmem:[%s1979_s1 + $0x44] sm:$0xf]  ;;  %v1046_v41 = vld [vmem:[%s1979_s1 + $0x48] sm:$0xf0]  ;;  %v1045_v44 = vor.u32 %v1262_v36, %v1044_v35 }
   0xb   :  { %v1277_v42 = vld [vmem:[%s1979_s1 + $0xc4] sm:$0xf]  ;;  %v1110_v43 = vld [vmem:[%s1979_s1 + $0xc8] sm:$0xf0]  ;;  %v1109_v45 = vor.u32 %v1278_v39, %v1108_v37  ;;  %v1049_v46 = vor.u32 %v1261_v40, %v1046_v41  ;;  %v1036_v47 = vld [vmem:[%s1979_s1 + $0x30] sm:$0xf] }
   0xc   :  { %236 = vmatpush.bf16.msra.mxu0 %v1053_v29  ;;  %v1260_v48 = vld [vmem:[%s1979_s1 + $0x34] sm:$0xf0]  ;;  %v1100_v49 = vld [vmem:[%s1979_s1 + $0xb0] sm:$0xf]  ;;  %v1113_v50 = vor.u32 %v1277_v42, %v1110_v43  ;;  %v1259_v52 = vld [vmem:[%s1979_s1 + $0x34] sm:$0xf] }
   0xd   :  { %249 = vmatpush.bf16.msra.mxu1 %v1117_v33  ;;  %262 = vmatpush.bf16.msra.mxu2 %v1057_v34  ;;  %v1276_v51 = vld [vmem:[%s1979_s1 + $0xb4] sm:$0xf0]  ;;  %v1038_v53 = vld [vmem:[%s1979_s1 + $0x38] sm:$0xf0]  ;;  %v1275_v54 = vld [vmem:[%s1979_s1 + $0xb4] sm:$0xf]  ;;  %v1037_v56 = vor.u32 %v1260_v48, %v1036_v47 }
   0xe   :  { %275 = vmatpush.bf16.msra.mxu3 %v1121_v38  ;;  %v1102_v55 = vld [vmem:[%s1979_s1 + $0xb8] sm:$0xf0]  ;;  %v1101_v57 = vor.u32 %v1276_v51, %v1100_v49  ;;  %v1041_v58 = vor.u32 %v1259_v52, %v1038_v53  ;;  %v1028_v59 = vld [vmem:[%s1979_s1 + $0x20] sm:$0xf]  ;;  %v1258_v60 = vld [vmem:[%s1979_s1 + $0x24] sm:$0xf0] }
   0xf   :  { %v1092_v61 = vld [vmem:[%s1979_s1 + $0xa0] sm:$0xf]  ;;  %v1105_v62 = vor.u32 %v1275_v54, %v1102_v55  ;;  %v1274_v63 = vld [vmem:[%s1979_s1 + $0xa4] sm:$0xf0]  ;;  %v1257_v0 = vld [vmem:[%s1979_s1 + $0x24] sm:$0xf]  ;;  %v1029_v4 = vor.u32 %v1258_v60, %v1028_v59 }
  0x10   :  { %237 = vmatpush.bf16.msra.mxu0 %v1045_v44  ;;  %v1030_v1 = vld [vmem:[%s1979_s1 + $0x28] sm:$0xf0]  ;;  %v1273_v2 = vld [vmem:[%s1979_s1 + $0xa4] sm:$0xf]  ;;  %v1020_v5 = vld [vmem:[%s1979_s1 + $0x10] sm:$0xf]  ;;  %v1093_v6 = vor.u32 %v1274_v63, %v1092_v61 }
  0x11   :  { %250 = vmatpush.bf16.msra.mxu1 %v1109_v45  ;;  %263 = vmatpush.bf16.msra.mxu2 %v1049_v46  ;;  %v1094_v3 = vld [vmem:[%s1979_s1 + $0xa8] sm:$0xf0]  ;;  %v1033_v7 = vor.u32 %v1257_v0, %v1030_v1  ;;  %v1256_v8 = vld [vmem:[%s1979_s1 + $0x14] sm:$0xf0]  ;;  %v1084_v9 = vld [vmem:[%s1979_s1 + $0x90] sm:$0xf] }
  0x12   :  { %276 = vmatpush.bf16.msra.mxu3 %v1113_v50  ;;  %v1272_v10 = vld [vmem:[%s1979_s1 + $0x94] sm:$0xf0]  ;;  %v1097_v11 = vor.u32 %v1273_v2, %v1094_v3  ;;  %v1255_v12 = vld [vmem:[%s1979_s1 + $0x14] sm:$0xf]  ;;  %v1022_v13 = vld [vmem:[%s1979_s1 + $0x18] sm:$0xf0]  ;;  %v1021_v17 = vor.u32 %v1256_v8, %v1020_v5 }
  0x13   :  { %v35_v14 = vld [vmem:[%s1980_s0] sm:$0x3]  ;;  %v1271_v15 = vld [vmem:[%s1979_s1 + $0x94] sm:$0xf]  ;;  %v1086_v16 = vld [vmem:[%s1979_s1 + $0x98] sm:$0xf0]  ;;  %v1085_v18 = vor.u32 %v1272_v10, %v1084_v9  ;;  %v1025_v19 = vor.u32 %v1255_v12, %v1022_v13 }
  0x14   :  { %238 = vmatpush.bf16.msra.mxu0 %v1037_v56  ;;  %69 = vst [vmem:[#allocation1] ss:$9 sm:$0xff] %v35_v14  ;;  %v1012_v20 = vld [vmem:[%s1979_s1] sm:$0xf]  ;;  %v1254_v21 = vld [vmem:[%s1979_s1 + $0x4] sm:$0xf0]  ;;  %v1089_v23 = vor.u32 %v1271_v15, %v1086_v16 }
  0x15   :  { %251 = vmatpush.bf16.msra.mxu1 %v1101_v57  ;;  %264 = vmatpush.bf16.msra.mxu2 %v1041_v58  ;;  %v1076_v22 = vld [vmem:[%s1979_s1 + $0x80] sm:$0xf]  ;;  %v1270_v24 = vld [vmem:[%s1979_s1 + $0x84] sm:$0xf0]  ;;  %v1253_v25 = vld [vmem:[%s1979_s1 + $0x4] sm:$0xf]  ;;  %v1013_v29 = vor.u32 %v1254_v21, %v1012_v20 }
  0x16   :  { %277 = vmatpush.bf16.msra.mxu3 %v1105_v62  ;;  %v1014_v26 = vld [vmem:[%s1979_s1 + $0x8] sm:$0xf0]  ;;  %v1269_v27 = vld [vmem:[%s1979_s1 + $0x84] sm:$0xf]  ;;  %v1077_v30 = vor.u32 %v1270_v24, %v1076_v22  ;;  %v352_v33 = vld [vmem:[%s1981_s2 + $0xf0] sm:$0xff] }
  0x17   :  { %v1078_v28 = vld [vmem:[%s1979_s1 + $0x88] sm:$0xf0]  ;;  %v1017_v31 = vor.u32 %v1253_v25, %v1014_v26  ;;  %v353_v35 = vld [vmem:[%s1981_s2 + $0xf8] sm:$0xff]  ;;  %v350_v37 = vld [vmem:[%s1981_s2 + $0xe0] sm:$0xff] }
  0x18   :  { %239 = vmatpush.bf16.msra.mxu0 %v1029_v4  ;;  %v1081_v32 = vor.u32 %v1269_v27, %v1078_v28  ;;  %v351_v38 = vld [vmem:[%s1981_s2 + $0xe8] sm:$0xff]  ;;  %v384_v39 = vld [vmem:[%s1981_s2 + $0x1f0] sm:$0xff]  ;;  %v385_v41 = vld [vmem:[%s1981_s2 + $0x1f8] sm:$0xff] }
  0x19   :  { %252 = vmatpush.bf16.msra.mxu1 %v1093_v6  ;;  %265 = vmatpush.bf16.msra.mxu2 %v1033_v7  ;;  %v348_v40 = vld [vmem:[%s1981_s2 + $0xd0] sm:$0xff]  ;;  %v349_v42 = vld [vmem:[%s1981_s2 + $0xd8] sm:$0xff]  ;;  %v382_v43 = vld [vmem:[%s1981_s2 + $0x1e0] sm:$0xff] }
  0x1a   :  { %278 = vmatpush.bf16.msra.mxu3 %v1097_v11  ;;  %v346_v44 = vld [vmem:[%s1981_s2 + $0xc0] sm:$0xff]  ;;  %v383_v45 = vld [vmem:[%s1981_s2 + $0x1e8] sm:$0xff]  ;;  %v380_v47 = vld [vmem:[%s1981_s2 + $0x1d0] sm:$0xff] }
  0x1b   :  { %v70_v34 = vld [vmem:[#allocation1] sm:$0xff]  ;;  %v71_v36 = vld [vmem:[#allocation1 + $0x9] sm:$0xff]  ;;  %v381_v49 = vld [vmem:[%s1981_s2 + $0x1d8] sm:$0xff] }
  0x1c   :  { %240 = vmatpush.bf16.msra.mxu0 %v1021_v17  ;;  %v347_v46 = vld [vmem:[%s1981_s2 + $0xc8] sm:$0xff]  ;;  %v344_v48 = vld [vmem:[%s1981_s2 + $0xb0] sm:$0xff]  ;;  %v345_v50 = vld [vmem:[%s1981_s2 + $0xb8] sm:$0xff] }
  0x1d   :  { %253 = vmatpush.bf16.msra.mxu1 %v1085_v18  ;;  %266 = vmatpush.bf16.msra.mxu2 %v1025_v19  ;;  %v342_v51 = vld [vmem:[%s1981_s2 + $0xa0] sm:$0xff]  ;;  %v343_v52 = vld [vmem:[%s1981_s2 + $0xa8] sm:$0xff]  ;;  %v340_v53 = vld [vmem:[%s1981_s2 + $0x90] sm:$0xff] }
  0x1e   :  { %279 = vmatpush.bf16.msra.mxu3 %v1089_v23  ;;  %v378_v54 = vld [vmem:[%s1981_s2 + $0x1c0] sm:$0xff]  ;;  %v341_v55 = vld [vmem:[%s1981_s2 + $0x98] sm:$0xff]  ;;  %v379_v56 = vld [vmem:[%s1981_s2 + $0x1c8] sm:$0xff] }
  0x1f   :  { %v338_v57 = vld [vmem:[%s1981_s2 + $0x80] sm:$0xff]  ;;  %v376_v58 = vld [vmem:[%s1981_s2 + $0x1b0] sm:$0xff]  ;;  %v339_v59 = vld [vmem:[%s1981_s2 + $0x88] sm:$0xff] }
  0x20   :  { %241 = vmatpush.bf16.msra.mxu0 %v1013_v29  ;;  %v377_v60 = vld [vmem:[%s1981_s2 + $0x1b8] sm:$0xff]  ;;  %v336_v61 = vld [vmem:[%s1981_s2 + $0x70] sm:$0xff]  ;;  %v374_v62 = vld [vmem:[%s1981_s2 + $0x1a0] sm:$0xff] }
  0x21   :  { %254 = vmatpush.bf16.msra.mxu1 %v1077_v30  ;;  %267 = vmatpush.bf16.msra.mxu2 %v1017_v31  ;;  %v337_v63 = vld [vmem:[%s1981_s2 + $0x78] sm:$0xff]  ;;  %v375_v0 = vld [vmem:[%s1981_s2 + $0x1a8] sm:$0xff]  ;;  %v334_v1 = vld [vmem:[%s1981_s2 + $0x60] sm:$0xff] }
  0x22   :  { %280 = vmatpush.bf16.msra.mxu3 %v1081_v32  ;;  %v372_v2 = vld [vmem:[%s1981_s2 + $0x190] sm:$0xff]  ;;  %v335_v3 = vld [vmem:[%s1981_s2 + $0x68] sm:$0xff]  ;;  %v373_v4 = vld [vmem:[%s1981_s2 + $0x198] sm:$0xff] }
  0x23   :  { %242 = vmatmul.bf16.vlgmr.msra.gmra.mxu0 %v70_v34  ;;  %v332_v5 = vld [vmem:[%s1981_s2 + $0x50] sm:$0xff]  ;;  %v370_v6 = vld [vmem:[%s1981_s2 + $0x180] sm:$0xff]  ;;  %v333_v7 = vld [vmem:[%s1981_s2 + $0x58] sm:$0xff] }
  0x24   :  { %386 = vmatpush.msrb.mxu0 %v352_v33  ;;  %255 = vmatmul.bf16.vlgmr.msra.gmra.mxu1 %v71_v36  ;;  %v371_v8 = vld [vmem:[%s1981_s2 + $0x188] sm:$0xff]  ;;  %v330_v9 = vld [vmem:[%s1981_s2 + $0x40] sm:$0xff]  ;;  %v368_v10 = vld [vmem:[%s1981_s2 + $0x170] sm:$0xff] }
  0x25   :  { %426 = vmatpush.msrb.mxu2 %v353_v35  ;;  %281 = vmatmul.bf16.vlgmr.msra.gmra.mxu3 %v71_v36  ;;  %v331_v11 = vld [vmem:[%s1981_s2 + $0x48] sm:$0xff]  ;;  %v369_v12 = vld [vmem:[%s1981_s2 + $0x178] sm:$0xff]  ;;  %v328_v13 = vld [vmem:[%s1981_s2 + $0x30] sm:$0xff] }
  0x26   :  { %268 = vmatmul.bf16.vlgmr.msra.gmra.mxu2 %v70_v34  ;;  %387 = vmatpush.msrb.mxu0 %v350_v37  ;;  %v366_v14 = vld [vmem:[%s1981_s2 + $0x160] sm:$0xff]  ;;  %v329_v15 = vld [vmem:[%s1981_s2 + $0x38] sm:$0xff]  ;;  %v367_v16 = vld [vmem:[%s1981_s2 + $0x168] sm:$0xff] }
  0x27   :  { %427 = vmatpush.msrb.mxu2 %v351_v38  ;;  %406 = vmatpush.msrb.mxu1 %v384_v39  ;;  %v326_v17 = vld [vmem:[%s1981_s2 + $0x20] sm:$0xff]  ;;  %v364_v18 = vld [vmem:[%s1981_s2 + $0x150] sm:$0xff]  ;;  %v327_v19 = vld [vmem:[%s1981_s2 + $0x28] sm:$0xff] }
  0x28   :  { %388 = vmatpush.msrb.mxu0 %v348_v40  ;;  %446 = vmatpush.msrb.mxu3 %v385_v41  ;;  %v365_v20 = vld [vmem:[%s1981_s2 + $0x158] sm:$0xff]  ;;  %v324_v21 = vld [vmem:[%s1981_s2 + $0x10] sm:$0xff]  ;;  %v362_v22 = vld [vmem:[%s1981_s2 + $0x140] sm:$0xff] }
  0x29   :  { %428 = vmatpush.msrb.mxu2 %v349_v42  ;;  %407 = vmatpush.msrb.mxu1 %v382_v43  ;;  %v325_v23 = vld [vmem:[%s1981_s2 + $0x18] sm:$0xff]  ;;  %v363_v24 = vld [vmem:[%s1981_s2 + $0x148] sm:$0xff]  ;;  %v322_v25 = vld [vmem:[%s1981_s2] sm:$0xff] }
  0x2a   :  { %389 = vmatpush.msrb.mxu0 %v346_v44  ;;  %447 = vmatpush.msrb.mxu3 %v383_v45  ;;  %v360_v26 = vld [vmem:[%s1981_s2 + $0x130] sm:$0xff]  ;;  %v323_v27 = vld [vmem:[%s1981_s2 + $0x8] sm:$0xff]  ;;  %v361_v28 = vld [vmem:[%s1981_s2 + $0x138] sm:$0xff] }
  0x2b   :  { %429 = vmatpush.msrb.mxu2 %v347_v46  ;;  %408 = vmatpush.msrb.mxu1 %v380_v47  ;;  %v358_v29 = vld [vmem:[%s1981_s2 + $0x120] sm:$0xff]  ;;  %v359_v30 = vld [vmem:[%s1981_s2 + $0x128] sm:$0xff]  ;;  %v356_v31 = vld [vmem:[%s1981_s2 + $0x110] sm:$0xff]  ;;  %v317_v47 = vlaneseq }
  0x2c   :  { %390 = vmatpush.msrb.mxu0 %v344_v48  ;;  %448 = vmatpush.msrb.mxu3 %v381_v49  ;;  %v357_v32 = vld [vmem:[%s1981_s2 + $0x118] sm:$0xff]  ;;  %v354_v33 = vld [vmem:[%s1981_s2 + $0x100] sm:$0xff]  ;;  %v355_v34 = vld [vmem:[%s1981_s2 + $0x108] sm:$0xff] }
  0x2d   :  { %430 = vmatpush.msrb.mxu2 %v345_v50  ;;  %409 = vmatpush.msrb.mxu1 %v378_v54 }
  0x2e   :  { %391 = vmatpush.msrb.mxu0 %v342_v51  ;;  %449 = vmatpush.msrb.mxu3 %v379_v56 }
  0x2f   :  { %431 = vmatpush.msrb.mxu2 %v343_v52  ;;  %410 = vmatpush.msrb.mxu1 %v376_v58 }
  0x30   :  { %392 = vmatpush.msrb.mxu0 %v340_v53  ;;  %450 = vmatpush.msrb.mxu3 %v377_v60 }
  0x31   :  { %432 = vmatpush.msrb.mxu2 %v341_v55  ;;  %411 = vmatpush.msrb.mxu1 %v374_v62 }
  0x32   :  { %393 = vmatpush.msrb.mxu0 %v338_v57  ;;  %451 = vmatpush.msrb.mxu3 %v375_v0  ;;  %v1775_v57 = vshrl.u32 %v317_v47, 7 }
  0x33   :  { %433 = vmatpush.msrb.mxu2 %v339_v59  ;;  %412 = vmatpush.msrb.mxu1 %v372_v2 }
  0x34   :  { %394 = vmatpush.msrb.mxu0 %v336_v61  ;;  %452 = vmatpush.msrb.mxu3 %v373_v4  ;;  %vm319_vm1 = vcmp.eq.s32.totalorder %v1775_v57, 0  ;;  %v1310_v57 = vld [vmem:[%s1987_s7 + $0x8] sm:$0xff] }
  0x35   :  { %434 = vmatpush.msrb.mxu2 %v337_v63  ;;  %413 = vmatpush.msrb.mxu1 %v370_v6 }
  0x36   :  { %395 = vmatpush.msrb.mxu0 %v334_v1  ;;  %453 = vmatpush.msrb.mxu3 %v371_v8 }
  0x37   :  { %435 = vmatpush.msrb.mxu2 %v335_v3  ;;  %414 = vmatpush.msrb.mxu1 %v368_v10 }
  0x38   :  { %396 = vmatpush.msrb.mxu0 %v332_v5  ;;  %454 = vmatpush.msrb.mxu3 %v369_v12 }
  0x39   :  { %436 = vmatpush.msrb.mxu2 %v333_v7  ;;  %415 = vmatpush.msrb.mxu1 %v366_v14 }
  0x3a   :  { %397 = vmatpush.msrb.mxu0 %v330_v9  ;;  %455 = vmatpush.msrb.mxu3 %v367_v16  ;;  %v1291_v16 = vld [vmem:[%s1982_s3 + $0x30] sm:$0xff] }
  0x3b   :  { %437 = vmatpush.msrb.mxu2 %v331_v11  ;;  %416 = vmatpush.msrb.mxu1 %v364_v18  ;;  %v1290_v18 = vld [vmem:[%s1982_s3 + $0x28] sm:$0xff] }
  0x3c   :  { %398 = vmatpush.msrb.mxu0 %v328_v13  ;;  %456 = vmatpush.msrb.mxu3 %v365_v20  ;;  %v1289_v20 = vld [vmem:[%s1982_s3 + $0x20] sm:$0xff] }
  0x3d   :  { %438 = vmatpush.msrb.mxu2 %v329_v15  ;;  %417 = vmatpush.msrb.mxu1 %v362_v22  ;;  %v1292_v15 = vld [vmem:[%s1982_s3 + $0x38] sm:$0xff] }
  0x3e   :  { %399 = vmatpush.msrb.mxu0 %v326_v17  ;;  %457 = vmatpush.msrb.mxu3 %v363_v24  ;;  %v1300_v17 = vld [vmem:[%s1982_s3 + $0x78] sm:$0xff] }
  0x3f   :  { %439 = vmatpush.msrb.mxu2 %v327_v19  ;;  %418 = vmatpush.msrb.mxu1 %v360_v26  ;;  %v1299_v19 = vld [vmem:[%s1982_s3 + $0x70] sm:$0xff] }
  0x40   :  { %400 = vmatpush.msrb.mxu0 %v324_v21  ;;  %458 = vmatpush.msrb.mxu3 %v361_v28 }
  0x41   :  { %440 = vmatpush.msrb.mxu2 %v325_v23  ;;  %419 = vmatpush.msrb.mxu1 %v358_v29  ;;  %v1298_v23 = vld [vmem:[%s1982_s3 + $0x68] sm:$0xff] }
  0x42   :  { %401 = vmatpush.msrb.mxu0 %v322_v25  ;;  %459 = vmatpush.msrb.mxu3 %v359_v30  ;;  %v1288_v25 = vld [vmem:[%s1982_s3 + $0x18] sm:$0xff] }
  0x43   :  { %441 = vmatpush.msrb.mxu2 %v323_v27  ;;  %420 = vmatpush.msrb.mxu1 %v356_v31  ;;  %v1297_v27 = vld [vmem:[%s1982_s3 + $0x60] sm:$0xff]  ;;  %v1287_v31 = vld [vmem:[%s1982_s3 + $0x10] sm:$0xff] }
  0x44   :  { %460 = vmatpush.msrb.mxu3 %v357_v32  ;;  %660 = vmatpush.bf16.msra.mxu0 %v1292_v15 }
  0x45   :  { %421 = vmatpush.msrb.mxu1 %v354_v33 }
  0x46   :  { %461 = vmatpush.msrb.mxu3 %v355_v34  ;;  %v1296_v34 = vld [vmem:[%s1982_s3 + $0x58] sm:$0xff] }
  0x47   :  { %673 = vmatpush.bf16.msra.mxu1 %v1300_v17 }
  0x48   :  { %661 = vmatpush.bf16.msra.mxu0 %v1291_v16 }
  0x4b   :  { %674 = vmatpush.bf16.msra.mxu1 %v1299_v19 }
  0x4c   :  { %662 = vmatpush.bf16.msra.mxu0 %v1290_v18 }
  0x4f   :  { %675 = vmatpush.bf16.msra.mxu1 %v1298_v23 }
  0x50   :  { %663 = vmatpush.bf16.msra.mxu0 %v1289_v20 }
  0x53   :  { %676 = vmatpush.bf16.msra.mxu1 %v1297_v27 }
  0x54   :  { %664 = vmatpush.bf16.msra.mxu0 %v1288_v25 }
  0x57   :  { %677 = vmatpush.bf16.msra.mxu1 %v1296_v34  ;;  %v707_v34 = vld [vmem:[%s1983_s4 + $0x28] sm:$0xff] }
  0x58   :  { %665 = vmatpush.bf16.msra.mxu0 %v1287_v31  ;;  %v710_v31 = vld [vmem:[%s1983_s4 + $0x40] sm:$0xff] }
  0xa0   :  { %v243_v35 = vpop.f32.mrf.mxu0 }
  0xa1   :  { %v256_v36 = vpop.f32.mrf.mxu1 }
  0xa2   :  { %v1762_v37 = vadd.f32 %v256_v36, %v243_v35 }
  0xa4   :  { %v287_v38 = vsel %vm286_vm0, %v1762_v37, 0.0  ;;  %v301_v39 = vmul.f32 %v1762_v37, %v1762_v37 }
  0xa5   :  { %v288_v40 = vrot.slane %v287_v38, 4 }
  0xa6   :  { %v303_v41 = vsel %vm286_vm0, %v301_v39, 0.0 }
  0xa7   :  { %v289_v42 = vadd.f32 %v288_v40, %v287_v38  ;;  %v304_v43 = vrot.slane %v303_v41, 4  ;;  %v1286_v38 = vld [vmem:[%s1982_s3 + $0x8] sm:$0xff] }
  0xa8   :  { %v282_v45 = vpop.f32.mrf.mxu3  ;;  %v245_v46 = vpop.f32.mrf.mxu0  ;;  %666 = vmatpush.bf16.msra.mxu0 %v1286_v38  ;;  %v704_v38 = vld [vmem:[%s1983_s4 + $0x10] sm:$0xff] }
  0xa9   :  { %v269_v44 = vpop.f32.mrf.mxu2  ;;  %v290_v48 = vrot.slane %v289_v42, 2  ;;  %v305_v49 = vadd.f32 %v304_v43, %v303_v41  ;;  %v258_v51 = vpop.f32.mrf.mxu1  ;;  %v1295_v41 = vld [vmem:[%s1982_s3 + $0x50] sm:$0xff]  ;;  %v1285_v43 = vld [vmem:[%s1982_s3] sm:$0xff] }
  0xaa   :  { %v1769_v50 = vadd.f32 %v282_v45, %v269_v44  ;;  %678 = vmatpush.bf16.msra.mxu1 %v1295_v41  ;;  %v1294_v45 = vld [vmem:[%s1982_s3 + $0x48] sm:$0xff] }
  0xab   :  { %v291_v52 = vadd.f32 %v290_v48, %v289_v42  ;;  %v306_v53 = vrot.slane %v305_v49, 2  ;;  %v1293_v48 = vld [vmem:[%s1982_s3 + $0x40] sm:$0xff] }
  0xac   :  { %v294_v54 = vsel %vm286_vm0, %v1769_v50, 0.0  ;;  %v302_v55 = vmul.f32 %v1769_v50, %v1769_v50  ;;  %667 = vmatpush.bf16.msra.mxu0 %v1285_v43 }
  0xad   :  { %v295_v56 = vrot.slane %v294_v54, 4  ;;  %v292_v59 = vrot.slane %v291_v52, 1  ;;  %v307_v60 = vadd.f32 %v306_v53, %v305_v49 }
  0xae   :  { %v310_v58 = vsel %vm286_vm0, %v302_v55, 0.0  ;;  %679 = vmatpush.bf16.msra.mxu1 %v1294_v45  ;;  %v716_v55 = vld [vmem:[%s1983_s4 + $0x70] sm:$0xff] }
  0xaf   :  { %v296_v61 = vadd.f32 %v295_v56, %v294_v54  ;;  %v311_v62 = vrot.slane %v310_v58, 4  ;;  %v308_v0 = vrot.slane %v307_v60, 1  ;;  %v293_v4 = vadd.f32 %v292_v59, %v291_v52  ;;  %v717_v54 = vld [vmem:[%s1983_s4 + $0x78] sm:$0xff]  ;;  %v715_v59 = vld [vmem:[%s1983_s4 + $0x68] sm:$0xff] }
  0xb0   :  { %v284_v3 = vpop.f32.mrf.mxu3  ;;  %718 = vmatpush.msra.mxu2 %v717_v54 }
  0xb1   :  { %v271_v63 = vpop.f32.mrf.mxu2  ;;  %v297_v1 = vrot.slane %v296_v61, 2  ;;  %v312_v2 = vadd.f32 %v311_v62, %v310_v58  ;;  %v309_v5 = vadd.f32 %v308_v0, %v307_v60  ;;  %v1853_v62 = vld [vmem:[%s1984_s8] sm:$0xff] }
  0xb2   :  { %680 = vmatpush.bf16.msra.mxu1 %v1293_v48  ;;  %719 = vmatpush.msra.mxu2 %v716_v55 }
  0xb3   :  { %v298_v6 = vadd.f32 %v297_v1, %v296_v61  ;;  %v313_v7 = vrot.slane %v312_v2, 2  ;;  %v320_v8 = vsel %vm319_vm1, %v293_v4, %v309_v5 }
  0xb4   :  { %402 = vmatmul.f32.vlgmr.msrb.gmra.mxu0 %v320_v8  ;;  %442 = vmatmul.f32.vlgmr.msrb.gmra.mxu2 %v320_v8 }
  0xb5   :  { %v299_v9 = vrot.slane %v298_v6, 1  ;;  %v314_v10 = vadd.f32 %v313_v7, %v312_v2  ;;  %720 = vmatpush.msra.mxu2 %v715_v59 }
  0xb7   :  { %v315_v11 = vrot.slane %v314_v10, 1  ;;  %v300_v12 = vadd.f32 %v299_v9, %v298_v6  ;;  %v34_v6 = vld [vmem:[%s1984_s8 + $0x8] sm:$0xff] }
  0xb9   :  { %v316_v13 = vadd.f32 %v315_v11, %v314_v10 }
  0xbb   :  { %v321_v14 = vsel %vm319_vm1, %v300_v12, %v316_v13 }
  0xbc   :  { %422 = vmatmul.f32.vlgmr.msrb.gmra.mxu1 %v321_v14  ;;  %462 = vmatmul.f32.vlgmr.msrb.gmra.mxu3 %v321_v14 }
 0x131   :  { %v403_v21 = vpop.f32.mrf.mxu0 }
 0x137   :  { %v443_v29 = vpop.f32.mrf.mxu2 }
 0x139   :  { %v423_v22 = vpop.f32.mrf.mxu1 }
 0x13a   :  { %v1804_v24 = vadd.f32 %v423_v22, %v403_v21 }
 0x13c   :  { %v466_v26 = vmul.f32 %v1804_v24, %v1804_v24 }
 0x13e   :  { %v470_v28 = vrot.slane %v466_v26, 7 }
 0x13f   :  { %v463_v30 = vpop.f32.mrf.mxu3 }
 0x140   :  { %v474_v32 = vsub.f32 %v1804_v24, %v470_v28  ;;  %v1818_v33 = vadd.f32 %v463_v30, %v443_v29  ;;  %v713_v29 = vld [vmem:[%s1983_s4 + $0x58] sm:$0xff]  ;;  %v711_v30 = vld [vmem:[%s1983_s4 + $0x48] sm:$0xff] }
 0x142   :  { %v476_v35 = vmax.f32 %v474_v32, 0.0  ;;  %v467_v36 = vmul.f32 %v1818_v33, %v1818_v33  ;;  %v709_v32 = vld [vmem:[%s1983_s4 + $0x38] sm:$0xff] }
 0x144   :  { %v478_v39 = vadd.f32 1e-05, %v476_v35  ;;  %v471_v40 = vrot.slane %v467_v36, 7  ;;  %v706_v35 = vld [vmem:[%s1983_s4 + $0x20] sm:$0xff]  ;;  %v705_v36 = vld [vmem:[%s1983_s4 + $0x18] sm:$0xff] }
 0x146   :  { %1313 = vrsqrt.f32 %v478_v39  ;;  %v475_v42 = vsub.f32 %v1818_v33, %v471_v40  ;;  %vm486_vm3 = vweird.f32 %v478_v39  ;;  %v702_v40 = vld [vmem:[%s1983_s4] sm:$0xff] }
 0x148   :  { %v477_v44 = vmax.f32 %v475_v42, 0.0 }
 0x14a   :  { %v479_v46 = vadd.f32 1e-05, %v477_v44 }
 0x14c   :  { %v1314_v47 = vpop.eup %1313  ;;  %1315 = vrsqrt.f32 %v479_v46  ;;  %vm496_vm6 = vweird.f32 %v479_v46 }
 0x14d   :  { %v481_v49 = vmul.f32 %v1314_v47, %v478_v39  ;;  %vm487_vm2 = vweird.f32 %v1314_v47  ;;  %v703_v39 = vld [vmem:[%s1983_s4 + $0x8] sm:$0xff] }
 0x14e   :  { %vm488_vm4 = vmor %vm486_vm3, %vm487_vm2  ;;  %vm1004_vm3 = vcmask 1024  }
 0x14f   :  { %v482_v51 = vmul.f32 %v1314_v47, %v481_v49 }
 0x151   :  { %v483_v52 = vmul.f32 0.5, %v482_v51 }
 0x152   :  { %v1316_v53 = vpop.eup %1315 }
 0x153   :  { %v484_v56 = vsub.f32 1.5, %v483_v52  ;;  %v491_v58 = vmul.f32 %v1316_v53, %v479_v46  ;;  %vm497_vm5 = vweird.f32 %v1316_v53 }
 0x154   :  { %vm498_vm7 = vmor %vm496_vm6, %vm497_vm5 }
 0x155   :  { %v485_v60 = vmul.f32 %v1314_v47, %v484_v56  ;;  %v492_v61 = vmul.f32 %v1316_v53, %v491_v58 }
 0x157   :  { %v489_v63 = vsel %vm488_vm4, %v1314_v47, %v485_v60  ;;  %v493_v0 = vmul.f32 0.5, %v492_v61 }
 0x158   :  { %v502_v1 = vrot.slane %v489_v63, 1 }
 0x159   :  { %v494_v2 = vsub.f32 1.5, %v493_v0 }
 0x15a   :  { %v506_v3 = vmul.f32 %v502_v1, %v1853_v62  ;;  %v1308_v1 = vld [vmem:[%s1985_s5 + $0x38] sm:$0xff] }
 0x15b   :  { %v495_v4 = vmul.f32 %v1316_v53, %v494_v2  ;;  %838 = vmatpush.bf16.msra.mxu3 %v1308_v1  ;;  %v1307_v2 = vld [vmem:[%s1985_s5 + $0x30] sm:$0xff]  ;;  %v1312_v1 = vld [vmem:[%s1987_s7 + $0x18] sm:$0xff] }
 0x15c   :  { %v508_v5 = vmul.f32 %v506_v3, %v1804_v24  ;;  %v518_v9 = vperm.slane %v506_v3, 0  ;;  %v1306_v3 = vld [vmem:[%s1985_s5 + $0x28] sm:$0xff]  ;;  %976 = vmatpush.bf16.msrb.mxu1 %v1312_v1 }
 0x15d   :  { %v499_v7 = vsel %vm498_vm7, %v1316_v53, %v495_v4  ;;  %v1305_v4 = vld [vmem:[%s1985_s5 + $0x20] sm:$0xff] }
 0x15e   :  { %v512_v8 = vrot.slane %v508_v5, 7  ;;  %v503_v10 = vrot.slane %v499_v7, 1  ;;  %v520_v13 = vmul.f32 %v518_v9, %v1762_v37  ;;  %v714_v37 = vld [vmem:[%s1983_s4 + $0x60] sm:$0xff]  ;;  %v1304_v7 = vld [vmem:[%s1985_s5 + $0x18] sm:$0xff] }
 0x15f   :  { %721 = vmatpush.msra.mxu2 %v714_v37  ;;  %839 = vmatpush.bf16.msra.mxu3 %v1307_v2 }
 0x160   :  { %v516_v11 = vsub.f32 %v1853_v62, %v512_v8  ;;  %v507_v12 = vmul.f32 %v503_v10, %v34_v6  ;;  %v1303_v10 = vld [vmem:[%s1985_s5 + $0x10] sm:$0xff] }
 0x161   :  { %722 = vmatpush.msra.mxu2 %v713_v29 }
 0x162   :  { %v522_v14 = vperm.slane %v516_v11, 1  ;;  %v509_v15 = vmul.f32 %v507_v12, %v1818_v33  ;;  %v519_v17 = vperm.slane %v507_v12, 0  ;;  %v708_v33 = vld [vmem:[%s1983_s4 + $0x30] sm:$0xff] }
 0x163   :  { %840 = vmatpush.bf16.msra.mxu3 %v1306_v3 }
 0x164   :  { %v513_v16 = vrot.slane %v509_v15, 7  ;;  %v524_v18 = vadd.f32 %v522_v14, %v520_v13  ;;  %v521_v21 = vmul.f32 %v519_v17, %v1769_v50  ;;  %v712_v50 = vld [vmem:[%s1983_s4 + $0x50] sm:$0xff]  ;;  %v1302_v13 = vld [vmem:[%s1985_s5 + $0x8] sm:$0xff]  ;;  %v1301_v14 = vld [vmem:[%s1985_s5] sm:$0xff] }
 0x165   :  { %723 = vmatpush.msra.mxu2 %v712_v50 }
 0x166   :  { %v517_v19 = vsub.f32 %v34_v6, %v513_v16  ;;  %v526_v20 = vmul.f32 0.2, %v524_v18 }
 0x167   :  { %724 = vmatpush.msra.mxu2 %v711_v30  ;;  %841 = vmatpush.bf16.msra.mxu3 %v1305_v4  ;;  %v1311_v4 = vld [vmem:[%s1987_s7 + $0x10] sm:$0xff] }
 0x168   :  { %v523_v22 = vperm.slane %v517_v19, 1  ;;  %v528_v23 = vmax.f32 %v524_v18, %v526_v20  ;;  %977 = vmatpush.bf16.msrb.mxu1 %v1311_v4 }
 0x169   :  { %725 = vmatpush.msra.mxu2 %v710_v31 }
 0x16a   :  { %v530_v24 = vpack.c.bf16 %v528_v23, %v528_v23  ;;  %v525_v25 = vadd.f32 %v523_v22, %v521_v21 }
 0x16b   :  { %726 = vmatpush.msra.mxu2 %v709_v32  ;;  %842 = vmatpush.bf16.msra.mxu3 %v1304_v7  ;;  %v1309_v7 = vld [vmem:[%s1987_s7] sm:$0xff] }
 0x16c   :  { %668 = vmatmul.bf16.vlgmr.msra.gmra.mxu0 %v530_v24  ;;  %v527_v26 = vmul.f32 0.2, %v525_v25  ;;  %978 = vmatpush.bf16.msrb.mxu1 %v1310_v57 }
 0x16d   :  { %727 = vmatpush.msra.mxu2 %v708_v33  ;;  %v875_v33 = vld [vmem:[%s1986_s6 + $0x38] sm:$0xff] }
 0x16e   :  { %v529_v27 = vmax.f32 %v525_v25, %v527_v26  ;;  %888 = vmatpush.msrb.mxu0 %v875_v33 }
 0x16f   :  { %728 = vmatpush.msra.mxu2 %v707_v34  ;;  %843 = vmatpush.bf16.msra.mxu3 %v1303_v10  ;;  %v874_v34 = vld [vmem:[%s1986_s6 + $0x30] sm:$0xff] }
 0x170   :  { %v531_v28 = vpack.c.bf16 %v529_v27, %v529_v27  ;;  %889 = vmatpush.msrb.mxu0 %v874_v34  ;;  %979 = vmatpush.bf16.msrb.mxu1 %v1309_v7 }
 0x171   :  { %729 = vmatpush.msra.mxu2 %v706_v35  ;;  %v873_v35 = vld [vmem:[%s1986_s6 + $0x28] sm:$0xff] }
 0x172   :  { %681 = vmatmul.bf16.vlgmr.msra.gmra.mxu1 %v531_v28  ;;  %890 = vmatpush.msrb.mxu0 %v873_v35 }
 0x173   :  { %730 = vmatpush.msra.mxu2 %v705_v36  ;;  %844 = vmatpush.bf16.msra.mxu3 %v1302_v13  ;;  %v872_v36 = vld [vmem:[%s1986_s6 + $0x20] sm:$0xff] }
 0x174   :  { %891 = vmatpush.msrb.mxu0 %v872_v36 }
 0x175   :  { %731 = vmatpush.msra.mxu2 %v704_v38  ;;  %v871_v38 = vld [vmem:[%s1986_s6 + $0x18] sm:$0xff] }
 0x176   :  { %892 = vmatpush.msrb.mxu0 %v871_v38 }
 0x177   :  { %732 = vmatpush.msra.mxu2 %v703_v39  ;;  %845 = vmatpush.bf16.msra.mxu3 %v1301_v14  ;;  %v870_v39 = vld [vmem:[%s1986_s6 + $0x10] sm:$0xff] }
 0x178   :  { %893 = vmatpush.msrb.mxu0 %v870_v39 }
 0x179   :  { %733 = vmatpush.msra.mxu2 %v702_v40  ;;  %v869_v40 = vld [vmem:[%s1986_s6 + $0x8] sm:$0xff] }
 0x17a   :  { %894 = vmatpush.msrb.mxu0 %v869_v40 }
 0x1e9   :  { %v669_v41 = vpop.f32.mrf.mxu0 }
 0x1ef   :  { %v682_v42 = vpop.f32.mrf.mxu1 }
 0x1f0   :  { %v683_v43 = vadd.f32 %v682_v42, %v669_v41  ;;  %v868_v41 = vld [vmem:[%s1986_s6] sm:$0xff] }
 0x1f1   :  { %v671_v44 = vpop.f32.mrf.mxu0  ;;  %895 = vmatpush.msrb.mxu0 %v868_v41 }
 0x1f2   :  { %v686_v45 = vsel %vm286_vm0, %v683_v43, 0.0  ;;  %v693_v46 = vmul.f32 %v683_v43, %v683_v43 }
 0x1f3   :  { %v687_v47 = vrot.slane %v686_v45, 4 }
 0x1f4   :  { %v694_v48 = vsel %vm286_vm0, %v693_v46, 0.0 }
 0x1f5   :  { %v688_v49 = vadd.f32 %v687_v47, %v686_v45  ;;  %v695_v51 = vrot.slane %v694_v48, 4 }
 0x1f7   :  { %v689_v52 = vrot.slane %v688_v49, 2  ;;  %v696_v53 = vadd.f32 %v695_v51, %v694_v48  ;;  %v684_v54 = vpop.f32.mrf.mxu1 }
 0x1f9   :  { %v690_v55 = vadd.f32 %v689_v52, %v688_v49  ;;  %v697_v56 = vrot.slane %v696_v53, 2 }
 0x1fb   :  { %v691_v58 = vrot.slane %v690_v55, 1  ;;  %v698_v59 = vadd.f32 %v697_v56, %v696_v53 }
 0x1fd   :  { %v699_v60 = vrot.slane %v698_v59, 1  ;;  %v692_v61 = vadd.f32 %v691_v58, %v690_v55 }
 0x1ff   :  { %v700_v63 = vadd.f32 %v699_v60, %v698_v59 }
 0x201   :  { %v701_v0 = vsel %vm319_vm1, %v692_v61, %v700_v63 }
 0x202   :  { %734 = vmatmul.f32.vlgmr.msra.gmra.mxu2 %v701_v0 }
 0x285   :  { %v735_v5 = vpop.f32.mrf.mxu2 }
 0x286   :  { %v738_v6 = vmul.f32 %v735_v5, %v735_v5 }
 0x288   :  { %v740_v8 = vrot.slane %v738_v6, 7 }
 0x28a   :  { %v742_v9 = vsub.f32 %v735_v5, %v740_v8 }
 0x28c   :  { %v743_v11 = vmax.f32 %v742_v9, 0.0 }
 0x28e   :  { %v744_v12 = vadd.f32 1e-05, %v743_v11 }
 0x290   :  { %1317 = vrsqrt.f32 %v744_v12  ;;  %vm751_vm9 = vweird.f32 %v744_v12 }
 0x296   :  { %v1318_v15 = vpop.eup %1317 }
 0x297   :  { %v746_v16 = vmul.f32 %v1318_v15, %v744_v12  ;;  %vm752_vm8 = vweird.f32 %v1318_v15 }
 0x298   :  { %vm753_vm10 = vmor %vm751_vm9, %vm752_vm8 }
 0x299   :  { %v747_v17 = vmul.f32 %v1318_v15, %v746_v16 }
 0x29b   :  { %v748_v18 = vmul.f32 0.5, %v747_v17 }
 0x29d   :  { %v749_v19 = vsub.f32 1.5, %v748_v18 }
 0x29f   :  { %v750_v20 = vmul.f32 %v1318_v15, %v749_v19 }
 0x2a1   :  { %v754_v21 = vsel %vm753_vm10, %v1318_v15, %v750_v20 }
 0x2a2   :  { %v756_v22 = vrot.slane %v754_v21, 7 }
 0x2a4   :  { %v758_v23 = vmul.f32 %v756_v22, %v1853_v62 }
 0x2a6   :  { %v760_v24 = vrot.slane %v758_v23, 2  ;;  %v767_v27 = vperm.slane %v758_v23, 2 }
 0x2a8   :  { %v762_v25 = vmul.f32 %v760_v24, %v735_v5  ;;  %v768_v37 = vmul.f32 %v767_v27, %v683_v43 }
 0x2aa   :  { %v764_v26 = vrot.slane %v762_v25, 5 }
 0x2ac   :  { %v766_v28 = vsub.f32 %v1853_v62, %v764_v26 }
 0x2ae   :  { %v769_v29 = vperm.slane %v766_v28, 3  ;;  %v944_v28 = vperm.slane %v1853_v62, 6 }
 0x2b0   :  { %v770_v50 = vadd.f32 %v769_v29, %v768_v37 }
 0x2b2   :  { %v771_v30 = vmul.f32 0.2, %v770_v50 }
 0x2b4   :  { %v772_v31 = vmax.f32 %v770_v50, %v771_v30 }
 0x2b6   :  { %v773_v32 = vpack.c.bf16 %v772_v31, %v772_v31 }
 0x2b8   :  { %846 = vmatmul.bf16.vlgmr.msra.gmra.mxu3 %v773_v32 }
 0x33b   :  { %v847_v42 = vpop.f32.mrf.mxu3 }
 0x33c   :  { %v852_v43 = vsel %vm851_vm11, %v847_v42, 0.0  ;;  %v859_v44 = vmul.f32 %v847_v42, %v847_v42 }
 0x33d   :  { %v853_v45 = vrot.slane %v852_v43, 4 }
 0x33e   :  { %v860_v46 = vsel %vm851_vm11, %v859_v44, 0.0 }
 0x33f   :  { %v854_v47 = vadd.f32 %v853_v45, %v852_v43  ;;  %v861_v48 = vrot.slane %v860_v46, 4 }
 0x341   :  { %v855_v49 = vrot.slane %v854_v47, 2  ;;  %v862_v51 = vadd.f32 %v861_v48, %v860_v46 }
 0x343   :  { %v856_v52 = vadd.f32 %v855_v49, %v854_v47  ;;  %v863_v53 = vrot.slane %v862_v51, 2  ;;  %v849_v54 = vpop.f32.mrf.mxu3 }
 0x345   :  { %v857_v55 = vrot.slane %v856_v52, 1  ;;  %v864_v56 = vadd.f32 %v863_v53, %v862_v51 }
 0x347   :  { %v865_v58 = vrot.slane %v864_v56, 1  ;;  %v858_v59 = vadd.f32 %v857_v55, %v856_v52 }
 0x349   :  { %v866_v60 = vadd.f32 %v865_v58, %v864_v56 }
 0x34b   :  { %v867_v61 = vsel %vm319_vm1, %v858_v59, %v866_v60 }
 0x34c   :  { %1234 = vmatmul.msk.f32.vlgmr.msrb.gmra.mxu0 %vm876_vm12, %v867_v61 }
 0x3c9   :  { %v897_v63 = vpop.f32.mrf.mxu0 }
 0x3ca   :  { %v900_v0 = vmul.f32 %v897_v63, %v897_v63 }
 0x3cc   :  { %v902_v2 = vrot.slane %v900_v0, 7 }
 0x3ce   :  { %v904_v3 = vsub.f32 %v897_v63, %v902_v2 }
 0x3d0   :  { %v905_v5 = vmax.f32 %v904_v3, 0.0 }
 0x3d2   :  { %v906_v6 = vadd.f32 1e-05, %v905_v5 }
 0x3d4   :  { %1319 = vrsqrt.f32 %v906_v6  ;;  %vm913_vm14 = vweird.f32 %v906_v6 }
 0x3da   :  { %v1320_v8 = vpop.eup %1319 }
 0x3db   :  { %v908_v9 = vmul.f32 %v1320_v8, %v906_v6  ;;  %vm914_vm13 = vweird.f32 %v1320_v8 }
 0x3dc   :  { %vm915_vm15 = vmor %vm913_vm14, %vm914_vm13 }
 0x3dd   :  { %v909_v10 = vmul.f32 %v1320_v8, %v908_v9 }
 0x3df   :  { %v910_v11 = vmul.f32 0.5, %v909_v10 }
 0x3e1   :  { %v911_v12 = vsub.f32 1.5, %v910_v11 }
 0x3e3   :  { %v912_v13 = vmul.f32 %v1320_v8, %v911_v12 }
 0x3e5   :  { %v916_v14 = vsel %vm915_vm15, %v1320_v8, %v912_v13 }
 0x3e6   :  { %v918_v15 = vrot.slane %v916_v14, 5 }
 0x3e8   :  { %v920_v16 = vmul.f32 %v918_v15, %v1853_v62 }
 0x3ea   :  { %v922_v17 = vrot.slane %v920_v16, 4  ;;  %v929_v20 = vperm.slane %v920_v16, 4 }
 0x3ec   :  { %v924_v18 = vmul.f32 %v922_v17, %v897_v63  ;;  %v930_v22 = vmul.f32 %v929_v20, %v847_v42 }
 0x3ee   :  { %v926_v19 = vrot.slane %v924_v18, 3 }
 0x3f0   :  { %v928_v21 = vsub.f32 %v1853_v62, %v926_v19 }
 0x3f2   :  { %v931_v23 = vperm.slane %v928_v21, 5 }
 0x3f4   :  { %v932_v24 = vadd.f32 %v931_v23, %v930_v22 }
 0x3f6   :  { %v933_v25 = vmul.f32 0.2, %v932_v24 }
 0x3f8   :  { %v934_v26 = vmax.f32 %v932_v24, %v933_v25 }
 0x3fa   :  { %v935_v27 = vpack.c.bf16 %v934_v26, %v934_v26 }
 0x3fc   :  { %1251 = vmatmul.msk.bf16.vlgmr.msrb.gmra.mxu1 %vm876_vm12, %v935_v27 }
 0x479   :  { %v981_v37 = vpop.f32.mrf.mxu1 }
 0x47a   :  { %v982_v29 = vadd.f32 %v981_v37, %v944_v28 }
 0x47c   :  { %v1252_v50 = vmul.f32 -1.442695, %v982_v29 }
 0x47e   :  { %1321 = vpow2.f32 %v1252_v50 }
 0x481   :  { %v983_v30 = vpop.f32.mrf.mxu1 }
 0x484   :  { %v1322_v31 = vpop.eup %1321 }
 0x485   :  { %v988_v32 = vadd.f32 1.0, %v1322_v31 }
 0x487   :  { %1323 = vrcp.f32 %v988_v32  ;;  %v1000_v36 = vand.u32 2147483648, %v988_v32  ;;  %v998_v39 = vand.u32 2147483647, %v988_v32  ;;  %vm994_vm1 = vweird.f32 %v988_v32 }
 0x489   :  { %v1001_v41 = vor.u32 1.1754944e-38, %v1000_v36  ;;  %vm999_vm4 = vcmp.eq.f32.partialorder %v998_v39, 8.507059e+37 }
 0x48d   :  { %v1324_v33 = vpop.eup %1323 }
 0x48e   :  { %v990_v34 = vmul.f32 %v1324_v33, %v988_v32  ;;  %vm995_vm0 = vweird.f32 %v1324_v33 }
 0x48f   :  { %vm996_vm2 = vmor %vm994_vm1, %vm995_vm0 }
 0x490   :  { %v991_v35 = vsub.f32 1.0, %v990_v34 }
 0x492   :  { %v992_v38 = vmul.f32 %v1324_v33, %v991_v35 }
 0x494   :  { %v993_v40 = vadd.f32 %v1324_v33, %v992_v38 }
 0x496   :  { %v997_v62 = vsel %vm996_vm2, %v1324_v33, %v993_v40 }
 0x497   :  { %v1002_v42 = vsel %vm999_vm4, %v1001_v41, %v997_v62 }
 0x498   :  { %1005 = vst.msk [vmem:[%s1988_s9] sm:$0x3] %vm1004_vm3, %v1002_v42 }

</bundles_post_ra>
